<compile_context>
chip_gen: v5e
topology: v5e:2x2
jax: 0.10.0
libtpu: 0.0.40
codegen_flags: <defaults>
</compile_context>

<pallas_src>
import functools

import jax
import jax.numpy as jnp
from jax.experimental import pallas as pl
from jax.experimental.pallas import tpu as pltpu

_SUB = 16  # sublane-tile alignment (bf16 tile is (16, 128); also valid for f32)


def _round_up(x, m):
    return ((x + m - 1) // m) * m


def _ac_fused_kernel(x_ref, wn_ref, ww_ref, out_ref, *, s_aug, wn_cols, l2p, a_size):
    # x_ref : (TILE_B, s_aug)            augmented input tile  [x | 1 | zero-pad]   (bf16)
    # wn_ref: (s_aug + l2p + 16, wn_cols) "narrow" slab: [W1_aug ; W_out_blockdiag ; b_out] (bf16)
    # ww_ref: (wn_cols + 16, l2p)         "wide"   slab: [W2_cat ; b2_cat]                  (bf16)
    # out_ref: (TILE_B, wn_cols) f32      cols [0,a_size)=softmax(pi), col a_size=v, rest 0
    wdt = wn_ref.dtype
    x = x_ref[...]

    # --- shared trunk: h = relu(x @ W1 + b1); bias folded via the augmented ones column ---
    w1 = wn_ref[0:s_aug, :]
    h = jnp.maximum(jnp.dot(x, w1, preferred_element_type=jnp.float32), 0.0)

    # --- fused second layer (both heads): z = relu(h @ [Wpi2 | Wv2] + [bpi2 | bv2]) ---
    w2 = ww_ref[0:wn_cols, :]
    b2 = ww_ref[wn_cols:wn_cols + 1, :].astype(jnp.float32)
    z = jnp.maximum(
        jnp.dot(h.astype(wdt), w2, preferred_element_type=jnp.float32) + b2, 0.0)

    # --- fused block-diagonal output layer: cols [0,a_size) = pi logits, col a_size = v ---
    wo = wn_ref[s_aug:s_aug + l2p, :]
    bo = wn_ref[s_aug + l2p:s_aug + l2p + 1, :].astype(jnp.float32)
    out = jnp.dot(z.astype(wdt), wo, preferred_element_type=jnp.float32) + bo

    # --- masked softmax over the policy lanes only; keep the value lane as-is ---
    lane = jax.lax.broadcasted_iota(jnp.int32, out.shape, 1)
    is_pi = lane < a_size
    is_v = lane == a_size
    lm = jnp.where(is_pi, out, -jnp.inf)
    m = jnp.max(lm, axis=-1, keepdims=True)
    e = jnp.exp(lm - m)                        # exp(-inf) = 0 on masked/pad lanes
    denom = jnp.sum(e, axis=-1, keepdims=True)
    inv = pl.reciprocal(denom, approx=True)    # EUP slot
    inv = inv * (2.0 - denom * inv)            # one Newton step -> ~f32-exact row sums
    pi = e * inv
    out_ref[...] = jnp.where(is_v, out, pi)    # v lane untouched; pad lanes exactly 0


def pack_params(p, *, s_size, a_size, lyr1, lyr2, param_dtype=jnp.bfloat16):
    """Pack the 10 Linear params into two lane-dense slabs (done once per weight update).

    All row offsets are multiples of 16 so bf16 (16,128) sublane tiles stay aligned.
    """
    s_aug = _round_up(s_size + 1, _SUB)
    wn_cols = max(_round_up(lyr1, 128), _round_up(a_size + 1, 128))
    l2c = 2 * lyr2
    l2p = _round_up(l2c, 128)
    n_rows = s_aug + l2p + _SUB       # output-bias row sits at the start of the last 16-row band
    w_rows = wn_cols + _SUB

    # narrow slab (width wn_cols): [ W1 ; b1 ] / [ block-diag output weights ] / [ b_out ]
    narrow = jnp.zeros((n_rows, wn_cols), jnp.float32)
    narrow = narrow.at[:s_size, :lyr1].set(p["w1"])
    narrow = narrow.at[s_size, :lyr1].set(p["b1"][0])                        # augmented bias row
    narrow = narrow.at[s_aug:s_aug + lyr2, :a_size].set(p["wpi"])            # policy block
    narrow = narrow.at[s_aug + lyr2:s_aug + l2c, a_size].set(p["wv"][:, 0])  # value column
    narrow = narrow.at[s_aug + l2p, :a_size].set(p["bpi"][0])
    narrow = narrow.at[s_aug + l2p, a_size].set(p["bv"][0, 0])

    # wide slab (width l2p): [ Wpi2 | Wv2 ] / [ bpi2 | bv2 ]
    wide = jnp.zeros((w_rows, l2p), jnp.float32)
    wide = wide.at[:lyr1, :lyr2].set(p["wpi2"])
    wide = wide.at[:lyr1, lyr2:l2c].set(p["wv2"])
    wide = wide.at[wn_cols, :lyr2].set(p["bpi2"][0])
    wide = wide.at[wn_cols, lyr2:l2c].set(p["bv2"][0])

    meta = dict(s_size=s_size, a_size=a_size, s_aug=s_aug, wn_cols=wn_cols, l2p=l2p)
    return dict(narrow=narrow.astype(param_dtype), wide=wide.astype(param_dtype), meta=meta)


@functools.partial(
    jax.jit, static_argnames=("s_size", "a_size", "s_aug", "wn_cols", "l2p", "tile_b"))
def _forward_impl(x, narrow, wide, *, s_size, a_size, s_aug, wn_cols, l2p, tile_b):
    B = x.shape[0]
    tb = _round_up(min(tile_b, _round_up(B, _SUB)), _SUB)
    b_pad = _round_up(B, tb)
    dt = narrow.dtype

    # Augmented input: [x | 1 | zero-pad] built with one concat + one pad (no .at[].set passes).
    x_aug = jnp.concatenate([x.astype(dt), jnp.ones((B, 1), dt)], axis=1)
    x_aug = jnp.pad(x_aug, ((0, b_pad - B), (0, s_aug - (s_size + 1))))

    kernel = functools.partial(
        _ac_fused_kernel, s_aug=s_aug, wn_cols=wn_cols, l2p=l2p, a_size=a_size)

    out = pl.pallas_call(
        kernel,
        out_shape=jax.ShapeDtypeStruct((b_pad, wn_cols), jnp.float32),
        grid=(b_pad // tb,),
        in_specs=[
            pl.BlockSpec((tb, s_aug), lambda i: (i, 0)),          # x tile, double-buffered
            pl.BlockSpec(narrow.shape, lambda i: (0, 0)),         # weights: fetched once, resident
            pl.BlockSpec(wide.shape, lambda i: (0, 0)),
        ],
        out_specs=pl.BlockSpec((tb, wn_cols), lambda i: (i, 0)),  # lane-dense 128-wide slab
        compiler_params=pltpu.CompilerParams(
            dimension_semantics=("parallel",),                    # shard batch across TCs on v7x
            vmem_limit_bytes=32 * 1024 * 1024,                    # footprint <2 MiB; safe on v7x
        ),
    )(x_aug, narrow, wide)
    return out


def actor_critic_forward_slab(x, packed, *, tile_b=256):
    """Hot-path API: returns the padded (B_pad, 128) slab; cols [0,a_size)=pi, col a_size=v.
    Pad lanes are exactly 0; callers must ignore rows >= x.shape[0]."""
    return _forward_impl(x, packed["narrow"], packed["wide"], tile_b=tile_b, **packed["meta"])


def actor_critic_forward(x, packed, *, tile_b=256):
    """x: (B, s_size) float32. Returns (pi, v) matching the PyTorch module's forward."""
    out = actor_critic_forward_slab(x, packed, tile_b=tile_b)
    B = x.shape[0]
    a = packed["meta"]["a_size"]
    return out[:B, :a], out[:B, a:a + 1]


def init_params(key, s_size, a_size, lyr1=128, lyr2=256):
    """Deterministic init mirroring nn.Linear's U(-1/sqrt(fan_in), 1/sqrt(fan_in)).
    Weights stored transposed: (in_features, out_features); biases as (1, out_features)."""
    def linear(key, fan_in, fan_out):
        kw, kb = jax.random.split(key)
        bound = 1.0 / jnp.sqrt(jnp.float32(fan_in))
        w = jax.random.uniform(kw, (fan_in, fan_out), jnp.float32, -bound, bound)
        b = jax.random.uniform(kb, (1, fan_out), jnp.float32, -bound, bound)
        return w, b

    keys = jax.random.split(key, 5)
    w1, b1 = linear(keys[0], s_size, lyr1)
    wpi2, bpi2 = linear(keys[1], lyr1, lyr2)
    wpi, bpi = linear(keys[2], lyr2, a_size)
    wv2, bv2 = linear(keys[3], lyr1, lyr2)
    wv, bv = linear(keys[4], lyr2, 1)
    return dict(w1=w1, b1=b1, wpi2=wpi2, bpi2=bpi2, wpi=wpi, bpi=bpi,
                wv2=wv2, bv2=bv2, wv=wv, bv=bv)


def reference_forward(x, p):
    h = x @ p["w1"] + p["b1"]
    hr = jnp.maximum(h, 0.0)
    pi = jnp.maximum(hr @ p["wpi2"] + p["bpi2"], 0.0)
    pi = jax.nn.softmax(pi @ p["wpi"] + p["bpi"], axis=1)
    v = jnp.maximum(hr @ p["wv2"] + p["bv2"], 0.0)
    v = v @ p["wv"] + p["bv"]
    return pi, v


if __name__ == "__main__":
    S_SIZE, A_SIZE = 8, 4          # CartPole-ish dims
    LYR1, LYR2 = 128, 256

    key = jax.random.PRNGKey(0)
    k_x, k_x2, k_p = jax.random.split(key, 3)
    params = init_params(k_p, S_SIZE, A_SIZE, LYR1, LYR2)

    # Parameters are packed once per weight update (bf16 slabs -> half the weight DMA bytes).
    packed = pack_params(params, s_size=S_SIZE, a_size=A_SIZE, lyr1=LYR1, lyr2=LYR2)

    # Batched rollout call: 512 states -> grid of 2 x 256-row tiles ("parallel" batch axis).
    B = 512
    x = jax.random.normal(k_x, (B, S_SIZE), jnp.float32)
    pi, v = jax.block_until_ready(actor_critic_forward(x, packed, tile_b=256))

    pi_ref, v_ref = reference_forward(x, params)
    assert pi.shape == (B, A_SIZE) and v.shape == (B, 1)
    # bf16 weights/activations with f32 accumulation -> loosened tolerance vs. f32 reference.
    assert jnp.allclose(pi, pi_ref, atol=2e-2, rtol=2e-2), float(jnp.max(jnp.abs(pi - pi_ref)))
    assert jnp.allclose(v, v_ref, atol=2e-2, rtol=2e-2), float(jnp.max(jnp.abs(v - v_ref)))
    assert jnp.allclose(jnp.sum(pi, axis=1), 1.0, atol=1e-4)

    # Single rollout micro-step (B=8) still works (padded to one 16-row tile internally).
    x2 = jax.random.normal(k_x2, (8, S_SIZE), jnp.float32)
    pi2, v2 = jax.block_until_ready(actor_critic_forward(x2, packed))
    pi2_ref, v2_ref = reference_forward(x2, params)
    assert jnp.allclose(pi2, pi2_ref, atol=2e-2, rtol=2e-2), float(jnp.max(jnp.abs(pi2 - pi2_ref)))
    assert jnp.allclose(v2, v2_ref, atol=2e-2, rtol=2e-2), float(jnp.max(jnp.abs(v2 - v2_ref)))

    print("KERNEL_OK")
</pallas_src>

<mosaic_0001>
module attributes {stable_mosaic.version = 11 : i64} {
  func.func @_ac_fused_kernel(%arg0: i32, %arg1: memref<256x16xbf16, #tpu.memory_space<vmem>>, %arg2: memref<544x128xbf16, #tpu.memory_space<vmem>>, %arg3: memref<144x512xbf16, #tpu.memory_space<vmem>>, %arg4: memref<256x128xf32, #tpu.memory_space<vmem>>) attributes {dimension_semantics = [#tpu.dimension_semantics<parallel>], iteration_bounds = array<i64: 2>, scalar_prefetch = 0 : i64, scratch_operands = 0 : i64, tpu.core_type = #tpu.core_type<tc>, window_params = [{transform_indices = @transform_0, window_bounds = array<i64: 256, 16>}, {pipeline_mode = #tpu.pipeline_mode<synchronous>, transform_indices = @transform_1, window_bounds = array<i64: 544, 128>}, {pipeline_mode = #tpu.pipeline_mode<synchronous>, transform_indices = @transform_2, window_bounds = array<i64: 144, 512>}, {transform_indices = @transform_3, window_bounds = array<i64: 256, 128>}]} {
    %c0 = arith.constant 0 : index
    %c0_0 = arith.constant 0 : index
    %0 = vector.load %arg1[%c0, %c0_0] : memref<256x16xbf16, #tpu.memory_space<vmem>>, vector<256x16xbf16>
    %c0_1 = arith.constant 0 : index
    %c0_2 = arith.constant 0 : index
    %1 = vector.load %arg2[%c0_1, %c0_2] : memref<544x128xbf16, #tpu.memory_space<vmem>>, vector<16x128xbf16>
    %cst = arith.constant dense<0.000000e+00> : vector<256x128xf32>
    %2 = tpu.matmul %0, %1, %cst {dimension_numbers = #tpu.dot_dimension_numbers<[1], [0], [0], [1], [0, 0, 1, 1], [], []>} : vector<256x16xbf16>, vector<16x128xbf16>, vector<256x128xf32> -> vector<256x128xf32>
    %cst_3 = arith.constant 0.000000e+00 : f32
    %3 = vector.broadcast %cst_3 : f32 to vector<256x128xf32>
    %4 = arith.maximumf %2, %3 : vector<256x128xf32>
    %c0_4 = arith.constant 0 : index
    %c0_5 = arith.constant 0 : index
    %5 = vector.load %arg3[%c0_4, %c0_5] : memref<144x512xbf16, #tpu.memory_space<vmem>>, vector<128x512xbf16>
    %c128 = arith.constant 128 : index
    %c0_6 = arith.constant 0 : index
    %6 = vector.load %arg3[%c128, %c0_6] : memref<144x512xbf16, #tpu.memory_space<vmem>>, vector<1x512xbf16>
    %7 = arith.extf %6 : vector<1x512xbf16> to vector<1x512xf32>
    %8 = arith.truncf %4 : vector<256x128xf32> to vector<256x128xbf16>
    %cst_7 = arith.constant dense<0.000000e+00> : vector<256x512xf32>
    %9 = tpu.matmul %8, %5, %cst_7 {dimension_numbers = #tpu.dot_dimension_numbers<[1], [0], [0], [1], [0, 0, 1, 1], [], []>} : vector<256x128xbf16>, vector<128x512xbf16>, vector<256x512xf32> -> vector<256x512xf32>
    %10 = vector.broadcast %7 : vector<1x512xf32> to vector<256x512xf32>
    %11 = arith.addf %9, %10 : vector<256x512xf32>
    %cst_8 = arith.constant 0.000000e+00 : f32
    %12 = vector.broadcast %cst_8 : f32 to vector<256x512xf32>
    %13 = arith.maximumf %11, %12 : vector<256x512xf32>
    %c16 = arith.constant 16 : index
    %c0_9 = arith.constant 0 : index
    %14 = vector.load %arg2[%c16, %c0_9] : memref<544x128xbf16, #tpu.memory_space<vmem>>, vector<512x128xbf16>
    %c528 = arith.constant 528 : index
    %c0_10 = arith.constant 0 : index
    %15 = vector.load %arg2[%c528, %c0_10] : memref<544x128xbf16, #tpu.memory_space<vmem>>, vector<1x128xbf16>
    %16 = arith.extf %15 : vector<1x128xbf16> to vector<1x128xf32>
    %17 = arith.truncf %13 : vector<256x512xf32> to vector<256x512xbf16>
    %cst_11 = arith.constant dense<0.000000e+00> : vector<256x128xf32>
    %18 = tpu.matmul %17, %14, %cst_11 {dimension_numbers = #tpu.dot_dimension_numbers<[1], [0], [0], [1], [0, 0, 1, 1], [], []>} : vector<256x512xbf16>, vector<512x128xbf16>, vector<256x128xf32> -> vector<256x128xf32>
    %19 = vector.broadcast %16 : vector<1x128xf32> to vector<256x128xf32>
    %20 = arith.addf %18, %19 : vector<256x128xf32>
    %21 = tpu.iota {dimensions = array<i32: 1>} : vector<256x128xi32>
    %c4_i32 = arith.constant 4 : i32
    %22 = vector.broadcast %c4_i32 : i32 to vector<256x128xi32>
    %23 = arith.cmpi slt, %21, %22 : vector<256x128xi32>
    %c4_i32_12 = arith.constant 4 : i32
    %24 = vector.broadcast %c4_i32_12 : i32 to vector<256x128xi32>
    %25 = arith.cmpi eq, %21, %24 : vector<256x128xi32>
    %cst_13 = arith.constant 0xFF800000 : f32
    %26 = vector.broadcast %cst_13 : f32 to vector<256x128xf32>
    %27 = arith.select %23, %20, %26 : vector<256x128xi1>, vector<256x128xf32>
    %cst_14 = arith.constant dense<0xFF800000> : vector<256xf32>
    %28 = vector.multi_reduction <maximumf>, %27, %cst_14 [1] : vector<256x128xf32> to vector<256xf32>
    %29 = vector.shape_cast %28 : vector<256xf32> to vector<256x1xf32>
    %30 = vector.broadcast %29 : vector<256x1xf32> to vector<256x128xf32>
    %31 = arith.subf %27, %30 : vector<256x128xf32>
    %32 = math.exp %31 : vector<256x128xf32>
    %cst_15 = arith.constant dense<0.000000e+00> : vector<256xf32>
    %33 = vector.multi_reduction <add>, %32, %cst_15 [1] : vector<256x128xf32> to vector<256xf32>
    %34 = vector.shape_cast %33 : vector<256xf32> to vector<256x1xf32>
    %35 = tpu.reciprocal %34 {approx = true} : vector<256x1xf32> -> vector<256x1xf32>
    %36 = arith.mulf %34, %35 : vector<256x1xf32>
    %cst_16 = arith.constant 2.000000e+00 : f32
    %37 = vector.broadcast %cst_16 : f32 to vector<256x1xf32>
    %38 = arith.subf %37, %36 : vector<256x1xf32>
    %39 = arith.mulf %35, %38 : vector<256x1xf32>
    %40 = vector.broadcast %39 : vector<256x1xf32> to vector<256x128xf32>
    %41 = arith.mulf %32, %40 : vector<256x128xf32>
    %42 = arith.select %25, %20, %41 : vector<256x128xi1>, vector<256x128xf32>
    %c0_17 = arith.constant 0 : index
    %c0_18 = arith.constant 0 : index
    %43 = vector.load %arg4[%c0_17, %c0_18] : memref<256x128xf32, #tpu.memory_space<vmem>>, vector<256x128xf32>
    tpu.vector_store %arg4[%c0_17, %c0_18], %42 {strides = array<i32>} : memref<256x128xf32, #tpu.memory_space<vmem>>, vector<256x128xf32>,
    return
  }
  func.func @transform_0(%arg0: i32) -> (i32, i32) {
    %c0_i32 = arith.constant 0 : i32
    %c0_i32_0 = arith.constant 0 : i32
    return %arg0, %c0_i32 : i32, i32
  }
  func.func @transform_1(%arg0: i32) -> (i32, i32) {
    %c0_i32 = arith.constant 0 : i32
    %c0_i32_0 = arith.constant 0 : i32
    %c0_i32_1 = arith.constant 0 : i32
    return %c0_i32, %c0_i32_0 : i32, i32
  }
  func.func @transform_2(%arg0: i32) -> (i32, i32) {
    %c0_i32 = arith.constant 0 : i32
    %c0_i32_0 = arith.constant 0 : i32
    %c0_i32_1 = arith.constant 0 : i32
    return %c0_i32, %c0_i32_0 : i32, i32
  }
  func.func @transform_3(%arg0: i32) -> (i32, i32) {
    %c0_i32 = arith.constant 0 : i32
    %c0_i32_0 = arith.constant 0 : i32
    return %arg0, %c0_i32 : i32, i32
  }
}

</mosaic_0001>

<bundles_post_ra>
// kernel: _forward_impl.1
= control target key start
LH: loop header
LB: loop body
LE: loop exit
PB: predicated region body
PF: predicated region fallthrough
CT: control target
= control target key end

     0   :  { %8 = vsyncpa [#allocation3], 0  ;;  %s4507_s0 = inlined_call_operand.vmem [shape: bf16[512,16], index: 0, kind: input, shape index: {}]   ;;  %s4508_s1 = inlined_call_operand.vmem [shape: bf16[544,128], index: 1, kind: input, shape index: {}]   ;;  %s4509_s2 = inlined_call_operand.vmem [shape: bf16[144,512], index: 2, kind: input, shape index: {}]   ;;  %s4510_s3 = inlined_call_operand.hbm [shape: f32[512,128], index: 3, kind: output, shape index: {}]  }
   0x1   :  { %10 = vsyncpa [#allocation3 + $0x1], 0  ;;  %s3106_s12 = smov 0   ;;  %s3108_s13 = smov 0  }
   0x2   :  { %s3110_s14 = smov 0   ;;  %s3112_s15 = smov 0  }
   0x3 LB: > { %s3127_s16 = sadd.s32 4294967295, %s3082_s15   ;;  %s2406_s17 = sadd.s32 4294967294, %s3082_s15   ;;  %s3082_s15 = sphi %s3112_s15, %s4567_s15   ;;  %s3078_s14 = sphi %s3110_s14, %s4566_s14   ;;  %s3074_s13 = sphi %s3108_s13, %s4565_s13   ;;  %s3070_s12 = sphi %s3106_s12, %s4564_s12  }
   0x4   : > { %s3131_s18 = sadd.s32 1, %s3082_s15   ;;  %s91_s19 = sadd.s32 1, %s3078_s14 }
   0x5   : > { %s88_s20 = ssub.s32 %s3082_s15, %s3131_s18  ;;  %p101_p0 = scmp.ne.s32.totalorder %s3078_s14, %s3074_s13 }
   0x6   : > { %p89_p1 = scmp.eq.s32.totalorder %s88_s20, 0  ;;  %p102_p2 = scmp.eq.s32.totalorder %s3127_s16, 1 }
   0x7   : > { %p107_p3 = scmp.ne.s32.totalorder %s3074_s13, %s3070_s12  ;;  %p108_p4 = scmp.eq.s32.totalorder %s2406_s17, 1 }
   0x8   : > { %s3142_s21 = scalar_select %p89_p1, %s3078_s14, %s91_s19  }
   0x9   : > { %p3144_p5 = por %p102_p2, %p101_p0  ;;  %p3148_p6 = por %p108_p4, %p107_p3 }
   0xa   : > { %p2409_p7 = scmp.ge.s32.totalorder %s3082_s15, 1  ;;  %p141_p8 = scmp.lt.s32.totalorder %s3082_s15, 3 }
   0xc   : > { %p142_p9 = pnand %p2409_p7, %p141_p8 }
   0xe   : > { %145 = sbr.rel (%p142_p9) target bundleno = 1082 (0x43a), region = 32 }
  0x13   : > { %v2774_v0 = vld [vmem:[%s4508_s1] sm:$0xff]  ;;  %s2411_s26 = sshll.u32 %s3127_s16, 5  ;;  %vm293_vm0 = vcmask 130048   ;;  %v2805_v8 = vld [vmem:[%s4509_s2 + $0xec] sm:$0xf0]  ;;  %s162_s9 = sand.u32 1, %s3074_s13  }
  0x14   : > { %p166_p10 = scmp.lt.s32.totalorder %s2411_s26, 63  ;;  %349 = vmatpush.bf16.msra.mxu0 %v2774_v0  ;;  %2840 = vmatpush.bf16.msra.mxu1 %v2774_v0  ;;  %v2611_v7 = vld [vmem:[%s4509_s2 + $0xe0] sm:$0xf]  ;;  %v2801_v10 = vld [vmem:[%s4509_s2 + $0xcc] sm:$0xf0]  ;;  %s2410_s10 = sshll.u32 %s162_s9, 8 }
  0x15   : > { %2842 = vmatpush.bf16.msra.mxu3 %v2774_v0  ;;  %2841 = vmatpush.bf16.msra.mxu2 %v2774_v0  ;;  %v2595_v9 = vld [vmem:[%s4509_s2 + $0xc0] sm:$0xf]  ;;  %v2612_v11 = vor.u32 %v2805_v8, %v2611_v7  ;;  %v2619_v12 = vld [vmem:[%s4509_s2 + $0xe8] sm:$0xf]  ;;  %v2806_v13 = vld [vmem:[%s4509_s2 + $0xf4] sm:$0xf0] }
  0x16   : > { %s4569_s26 = smov (!%p166_p10, %s2411_s26), 63  ;;  %v2620_v14 = vor.u32 %v2806_v13, %v2619_v12  ;;  %v2579_v15 = vld [vmem:[%s4509_s2 + $0xa0] sm:$0xf]  ;;  %v2596_v16 = vor.u32 %v2801_v10, %v2595_v9  ;;  %v2603_v17 = vld [vmem:[%s4509_s2 + $0xc8] sm:$0xf]  ;;  %s2839_s11 = sshll.u32 %s3127_s16, 8 }
  0x17   : > { %s2412_s27 = sshll.u32 %s4569_s26, 2  ;;  %v2802_v18 = vld [vmem:[%s4509_s2 + $0xd4] sm:$0xf0]  ;;  %v2804_v19 = vld [vmem:[%s4509_s2 + $0xec] sm:$0xf]  ;;  %s2340_s20 = scalar_lea.hbm %s4510_s3, %s2839_s11 }
  0x18   : > { %s3161_s30 = scalar_lea.vmem %s4507_s0, %s2412_s27  ;;  %681 = vmatpush.bf16.msrb.mxu1 %v2612_v11  ;;  %v2797_v20 = vld [vmem:[%s4509_s2 + $0xac] sm:$0xf0]  ;;  %v2604_v21 = vor.u32 %v2802_v18, %v2603_v17  ;;  %v2621_v22 = vld [vmem:[%s4509_s2 + $0xf8] sm:$0xf0]  ;;  %v2587_v25 = vld [vmem:[%s4509_s2 + $0xa8] sm:$0xf] }
  0x19   : > { %v2758_v1 = vld [vmem:[%s3161_s30] sm:$0xff]  ;;  %v2759_v2 = vld [vmem:[%s3161_s30 + $0x8] sm:$0xff]  ;;  %v2760_v4 = vld [vmem:[%s3161_s30 + $0x10] sm:$0xff]  ;;  %859 = vmatpush.bf16.msrb.mxu3 %v2620_v14  ;;  %v2624_v24 = vor.u32 %v2804_v19, %v2621_v22  ;;  %v2580_v29 = vor.u32 %v2797_v20, %v2579_v15  ;;  %s2343_s25 = sshll.u32 %s2340_s20, 4  ;;  %s2329_s16 = scalar_lea.sflag [#allocation3], %s162_s9  ;;  %s2344_s25 = int_to_ptr.hbm [resolvable:$true] %s2343_s25 }
  0x1a   : > { %2481 = vmatmul.msk.bf16.vlgmr.msra.gmra.mxu0 %vm293_vm0, %v2758_v1  ;;  %v2763_v3 = vld [vmem:[%s3161_s30 + $0x28] sm:$0xff]  ;;  %v2764_v5 = vld [vmem:[%s3161_s30 + $0x30] sm:$0xff]  ;;  %v2770_v6 = vld [vmem:[%s3161_s30 + $0x60] sm:$0xff]  ;;  %s3034_s26 = sshra.s32 %s2344_s25, 4  ;;  %s3040_s4 = scalar_lea.hbm %s4510_s3, 512  ;;  %s3035_s26 = int_to_ptr.hbm [resolvable:$true] %s3034_s26 }
  0x1b   : > { %2486 = vmatmul.msk.bf16.vlgmr.msra.gmra.mxu1 %vm293_vm0, %v2763_v3  ;;  %2493 = vmatmul.msk.bf16.vlgmr.msra.gmra.mxu3 %vm293_vm0, %v2770_v6  ;;  %v2768_v23 = vld [vmem:[%s3161_s30 + $0x50] sm:$0xff]  ;;  %v2798_v26 = vld [vmem:[%s4509_s2 + $0xb4] sm:$0xf0]  ;;  %v2563_v27 = vld [vmem:[%s4509_s2 + $0x80] sm:$0xf]  ;;  %s3036_s27 = scalar_lea.hbm %s3035_s26, 256  ;;  %p3041_p0 = scmp.lt.s32.totalorder %s3035_s26, %s4510_s3 }
  0x1c   : > { %2491 = vmatmul.msk.bf16.vlgmr.msra.gmra.mxu2 %vm293_vm0, %v2768_v23  ;;  %v2803_v28 = vld [vmem:[%s4509_s2 + $0xe4] sm:$0xf]  ;;  %682 = vmatpush.bf16.msrb.mxu1 %v2596_v16  ;;  %v2613_v30 = vld [vmem:[%s4509_s2 + $0xf0] sm:$0xf0]  ;;  %v2800_v31 = vld [vmem:[%s4509_s2 + $0xcc] sm:$0xf]  ;;  %v2588_v34 = vor.u32 %v2798_v26, %v2587_v25  ;;  %p3037_p11 = scmp.ne.s32.totalorder %s3035_s26, %s3036_s27  ;;  %p3042_p1 = scmp.lt.s32.totalorder %s3040_s4, %s3036_s27 }
  0x1d   : > { %948 = vmatpush.bf16.msrb.mxu0 %v2624_v24  ;;  %v2605_v32 = vld [vmem:[%s4509_s2 + $0xd8] sm:$0xf0]  ;;  %860 = vmatpush.bf16.msrb.mxu3 %v2604_v21  ;;  %v2793_v33 = vld [vmem:[%s4509_s2 + $0x8c] sm:$0xf0]  ;;  %v2616_v35 = vor.u32 %v2803_v28, %v2613_v30  ;;  %v2799_v37 = vld [vmem:[%s4509_s2 + $0xc4] sm:$0xf] }
  0x1e   : > { %v2608_v36 = vor.u32 %v2800_v31, %v2605_v32  ;;  %v2597_v38 = vld [vmem:[%s4509_s2 + $0xd0] sm:$0xf0]  ;;  %v2571_v39 = vld [vmem:[%s4509_s2 + $0x88] sm:$0xf]  ;;  %v2794_v40 = vld [vmem:[%s4509_s2 + $0x94] sm:$0xf0]  ;;  %v2564_v46 = vor.u32 %v2793_v33, %v2563_v27  ;;  %p3038_p12 = pnand %p3037_p11, %p3144_p5  ;;  %p3043_p2 = por %p3042_p1, %p3041_p0 }
  0x1f   : > { %v2761_v41 = vld [vmem:[%s3161_s30 + $0x18] sm:$0xff]  ;;  %770 = vmatpush.bf16.msrb.mxu2 %v2616_v35  ;;  %v2600_v42 = vor.u32 %v2799_v37, %v2597_v38  ;;  %v2795_v43 = vld [vmem:[%s4509_s2 + $0xa4] sm:$0xf]  ;;  %v2771_v45 = vld [vmem:[%s3161_s30 + $0x68] sm:$0xff]  ;;  %v2572_v50 = vor.u32 %v2794_v40, %v2571_v39 }
  0x20   : > { %v2765_v44 = vld [vmem:[%s3161_s30 + $0x38] sm:$0xff]  ;;  %683 = vmatpush.bf16.msrb.mxu1 %v2580_v29  ;;  %v2581_v47 = vld [vmem:[%s4509_s2 + $0xb0] sm:$0xf0]  ;;  %v2796_v48 = vld [vmem:[%s4509_s2 + $0xac] sm:$0xf]  ;;  %p3039_p13 = pneg %p3038_p12 }
  0x21   : > { %949 = vmatpush.bf16.msrb.mxu0 %v2608_v36  ;;  %v2589_v49 = vld [vmem:[%s4509_s2 + $0xb8] sm:$0xf0]  ;;  %861 = vmatpush.bf16.msrb.mxu3 %v2588_v34  ;;  %v2547_v51 = vld [vmem:[%s4509_s2 + $0x60] sm:$0xf]  ;;  %v2789_v52 = vld [vmem:[%s4509_s2 + $0x6c] sm:$0xf0]  ;;  %v2584_v58 = vor.u32 %v2795_v43, %v2581_v47 }
  0x22   : > { %v2592_v53 = vor.u32 %v2796_v48, %v2589_v49  ;;  %v2792_v54 = vld [vmem:[%s4509_s2 + $0x8c] sm:$0xf]  ;;  %v2573_v55 = vld [vmem:[%s4509_s2 + $0x98] sm:$0xf0]  ;;  %v2555_v56 = vld [vmem:[%s4509_s2 + $0x68] sm:$0xf]  ;;  %v2548_v59 = vor.u32 %v2789_v52, %v2547_v51  ;;  %p3044_p3 = pnand %p3043_p2, %p3039_p13 }
  0x23   : > { %v2790_v57 = vld [vmem:[%s4509_s2 + $0x74] sm:$0xf0]  ;;  %771 = vmatpush.bf16.msrb.mxu2 %v2600_v42  ;;  %v2791_v60 = vld [vmem:[%s4509_s2 + $0x84] sm:$0xf]  ;;  %v2565_v61 = vld [vmem:[%s4509_s2 + $0x90] sm:$0xf0]  ;;  %v2576_v62 = vor.u32 %v2792_v54, %v2573_v55 }
  0x24   : > { %684 = vmatpush.bf16.msrb.mxu1 %v2564_v46  ;;  %v2556_v63 = vor.u32 %v2790_v57, %v2555_v56  ;;  %v2769_v0 = vld [vmem:[%s3161_s30 + $0x58] sm:$0xff]  ;;  %v2788_v1 = vld [vmem:[%s4509_s2 + $0x6c] sm:$0xf]  ;;  %v2531_v3 = vld [vmem:[%s4509_s2 + $0x40] sm:$0xf] }
  0x25   : > { %862 = vmatpush.bf16.msrb.mxu3 %v2572_v50  ;;  %950 = vmatpush.bf16.msrb.mxu0 %v2592_v53  ;;  %v2787_v6 = vld [vmem:[%s4509_s2 + $0x64] sm:$0xf]  ;;  %v2549_v7 = vld [vmem:[%s4509_s2 + $0x70] sm:$0xf0]  ;;  %v2767_v14 = vld [vmem:[%s3161_s30 + $0x48] sm:$0xff] }
  0x26   : > { %v2552_v10 = vor.u32 %v2787_v6, %v2549_v7  ;;  %v2762_v11 = vld [vmem:[%s3161_s30 + $0x20] sm:$0xff]  ;;  %v2772_v13 = vld [vmem:[%s3161_s30 + $0x70] sm:$0xff]  ;;  %v2773_v15 = vld [vmem:[%s3161_s30 + $0x78] sm:$0xff] }
  0x27   : > { %772 = vmatpush.bf16.msrb.mxu2 %v2584_v58  ;;  %v2766_v12 = vld [vmem:[%s3161_s30 + $0x40] sm:$0xff]  ;;  %v2533_v17 = vld [vmem:[%s4509_s2 + $0x50] sm:$0xf0]  ;;  %v2539_v18 = vld [vmem:[%s4509_s2 + $0x48] sm:$0xf]  ;;  %s4237_s30 = scalar_lea.vmem [#allocation2], %s2410_s10 }
  0x28   : > { %685 = vmatpush.bf16.msrb.mxu1 %v2548_v59  ;;  %v2783_v16 = vld [vmem:[%s4509_s2 + $0x44] sm:$0xf]  ;;  %v2786_v20 = vld [vmem:[%s4509_s2 + $0x54] sm:$0xf0]  ;;  %v2784_v21 = vld [vmem:[%s4509_s2 + $0x4c] sm:$0xf] }
  0x29   : > { %951 = vmatpush.bf16.msrb.mxu0 %v2576_v62  ;;  %863 = vmatpush.bf16.msrb.mxu3 %v2556_v63  ;;  %v2536_v19 = vor.u32 %v2783_v16, %v2533_v17  ;;  %v2541_v22 = vld [vmem:[%s4509_s2 + $0x58] sm:$0xf0]  ;;  %v2540_v23 = vor.u32 %v2786_v20, %v2539_v18  ;;  %v2779_v25 = vld [vmem:[%s4509_s2 + $0x24] sm:$0xf]  ;;  %v2517_v26 = vld [vmem:[%s4509_s2 + $0x30] sm:$0xf0] }
  0x2a   : > { %2482 = vmatmul.msk.bf16.gmra.mxu0 %vm293_vm0, %v2759_v2  ;;  %v2557_v2 = vld [vmem:[%s4509_s2 + $0x78] sm:$0xf0]  ;;  %v2544_v24 = vor.u32 %v2784_v21, %v2541_v22  ;;  %v2515_v27 = vld [vmem:[%s4509_s2 + $0x20] sm:$0xf]  ;;  %v2520_v28 = vor.u32 %v2779_v25, %v2517_v26  ;;  %v2781_v29 = vld [vmem:[%s4509_s2 + $0x2c] sm:$0xf0] }
  0x2b   : > { %2487 = vmatmul.msk.bf16.gmra.mxu1 %vm293_vm0, %v2764_v5  ;;  %2494 = vmatmul.msk.bf16.gmra.mxu3 %vm293_vm0, %v2771_v45  ;;  %v2785_v5 = vld [vmem:[%s4509_s2 + $0x4c] sm:$0xf0]  ;;  %v2560_v8 = vor.u32 %v2788_v1, %v2557_v2  ;;  %v2523_v30 = vld [vmem:[%s4509_s2 + $0x28] sm:$0xf]  ;;  %v2782_v31 = vld [vmem:[%s4509_s2 + $0x34] sm:$0xf0]  ;;  %v2516_v32 = vor.u32 %v2781_v29, %v2515_v27 }
  0x2c   : > { %v2532_v9 = vor.u32 %v2785_v5, %v2531_v3  ;;  %2492 = vmatmul.msk.bf16.gmra.mxu2 %vm293_vm0, %v2769_v0  ;;  %v2524_v33 = vor.u32 %v2782_v31, %v2523_v30  ;;  %v2780_v34 = vld [vmem:[%s4509_s2 + $0x2c] sm:$0xf]  ;;  %v2525_v35 = vld [vmem:[%s4509_s2 + $0x38] sm:$0xf0]  ;;  %v2775_v37 = vld [vmem:[%s4509_s2 + $0x4] sm:$0xf] }
  0x2d   : > { %952 = vmatpush.bf16.msrb.mxu0 %v2560_v8  ;;  %864 = vmatpush.bf16.msrb.mxu3 %v2540_v23  ;;  %v2528_v36 = vor.u32 %v2780_v34, %v2525_v35  ;;  %v2501_v38 = vld [vmem:[%s4509_s2 + $0x10] sm:$0xf0]  ;;  %v2499_v39 = vld [vmem:[%s4509_s2] sm:$0xf]  ;;  %v2507_v42 = vld [vmem:[%s4509_s2 + $0x8] sm:$0xf] }
  0x2e   : > { %686 = vmatpush.bf16.msrb.mxu1 %v2532_v9  ;;  %v2504_v40 = vor.u32 %v2775_v37, %v2501_v38  ;;  %v2778_v43 = vld [vmem:[%s4509_s2 + $0x14] sm:$0xf0]  ;;  %v2776_v46 = vld [vmem:[%s4509_s2 + $0xc] sm:$0xf]  ;;  %v2509_v47 = vld [vmem:[%s4509_s2 + $0x18] sm:$0xf0] }
  0x2f   : > { %v2508_v45 = vor.u32 %v2778_v43, %v2507_v42  ;;  %v2512_v48 = vor.u32 %v2776_v46, %v2509_v47  ;;  %v2822_v49 = vld [vmem:[%s4508_s1 + $0x80] sm:$0xff]  ;;  %v2821_v57 = vld [vmem:[%s4508_s1 + $0x78] sm:$0xff]  ;;  %v2820_v8 = vld [vmem:[%s4508_s1 + $0x70] sm:$0xff]  ;;  %s2341_s24 = sshll.u32 %s4237_s30, 4  ;;  %s2342_s24 = int_to_ptr.vmem [resolvable:$true] %s2341_s24 }
  0x30   : > { %v2830_v50 = vld [vmem:[%s4508_s1 + $0xc0] sm:$0xff]  ;;  %v2829_v0 = vld [vmem:[%s4508_s1 + $0xb8] sm:$0xff]  ;;  %v2812_v18 = vld [vmem:[%s4508_s1 + $0x30] sm:$0xff] }
  0x31   : > { %953 = vmatpush.bf16.msrb.mxu0 %v2544_v24  ;;  %865 = vmatpush.bf16.msrb.mxu3 %v2524_v33  ;;  %v2814_v51 = vld [vmem:[%s4508_s1 + $0x40] sm:$0xff]  ;;  %v2813_v1 = vld [vmem:[%s4508_s1 + $0x38] sm:$0xff]  ;;  %v3436_v29 = vld [vmem:[%s4508_s1 + $0xf0] sm:$0xff] }
  0x32   : > { %687 = vmatpush.bf16.msrb.mxu1 %v2516_v32  ;;  %v3402_v59 = vld [vmem:[%s4508_s1 + $0x100] sm:$0xff]  ;;  %v3417_v9 = vld [vmem:[%s4508_s1 + $0xf8] sm:$0xff]  ;;  %v2827_v30 = vld [vmem:[%s4508_s1 + $0xa8] sm:$0xff] }
  0x35   : > { %954 = vmatpush.bf16.msrb.mxu0 %v2528_v36  ;;  %866 = vmatpush.bf16.msrb.mxu3 %v2508_v45  ;;  %v2811_v36 = vld [vmem:[%s4508_s1 + $0x28] sm:$0xff]  ;;  %v2818_v45 = vld [vmem:[%s4508_s1 + $0x60] sm:$0xff] }
  0x39   : > { %955 = vmatpush.bf16.msrb.mxu0 %v2512_v48  ;;  %1666 = vmatpush.bf16.msra.mxu3 %v2830_v50 }
  0x3a   : > { %2483 = vmatmul.msk.bf16.gmra.mxu0 %vm293_vm0, %v2760_v4  ;;  %v2568_v4 = vor.u32 %v2791_v60, %v2565_v61 }
  0x3b   : > { %2488 = vmatmul.msk.bf16.gmra.mxu1 %vm293_vm0, %v2765_v44  ;;  %2495 = vmatmul.msk.bf16.gmra.mxu3 %vm293_vm0, %v2772_v13 }
  0x3c   : > { %773 = vmatpush.bf16.msrb.mxu2 %v2568_v4 }
  0x3d   : > { %1755 = vmatpush.bf16.msra.mxu0 %v3402_v59  ;;  %1667 = vmatpush.bf16.msra.mxu3 %v2829_v0 }
  0x40   : > { %774 = vmatpush.bf16.msrb.mxu2 %v2552_v10  ;;  %v2828_v10 = vld [vmem:[%s4508_s1 + $0xb0] sm:$0xff] }
  0x41   : > { %1756 = vmatpush.bf16.msra.mxu0 %v3417_v9  ;;  %1668 = vmatpush.bf16.msra.mxu3 %v2828_v10 }
  0x44   : > { %775 = vmatpush.bf16.msrb.mxu2 %v2536_v19 }
  0x45   : > { %1757 = vmatpush.bf16.msra.mxu0 %v3436_v29  ;;  %1669 = vmatpush.bf16.msra.mxu3 %v2827_v30 }
  0x48   : > { %776 = vmatpush.bf16.msrb.mxu2 %v2520_v28  ;;  %v2819_v28 = vld [vmem:[%s4508_s1 + $0x68] sm:$0xff] }
  0x4a   : > { %2484 = vmatmul.msk.bf16.gmra.mxu0 %vm293_vm0, %v2761_v41  ;;  %v2777_v41 = vld [vmem:[%s4509_s2 + $0xc] sm:$0xf0] }
  0x4b   : > { %2489 = vmatmul.msk.bf16.gmra.mxu1 %vm293_vm0, %v2766_v12  ;;  %2496 = vmatmul.msk.bf16.gmra.mxu3 %vm293_vm0, %v2773_v15  ;;  %v2500_v44 = vor.u32 %v2777_v41, %v2499_v39 }
  0x4c   : > { %777 = vmatpush.bf16.msrb.mxu2 %v2504_v40 }
  0x4d   : > { %688 = vmatpush.bf16.msrb.mxu1 %v2500_v44 }
  0x50   : > { %1577 = vmatpush.bf16.msra.mxu2 %v2822_v49 }
  0x51   : > { %1488 = vmatpush.bf16.msra.mxu1 %v2814_v51  ;;  %v3465_v51 = vld [vmem:[%s4508_s1 + $0xe8] sm:$0xff] }
  0x52   : > { %1758 = vmatpush.bf16.msra.mxu0 %v3465_v51 }
  0x54   : > { %1578 = vmatpush.bf16.msra.mxu2 %v2821_v57 }
  0x55   : > { %1489 = vmatpush.bf16.msra.mxu1 %v2813_v1 }
  0x58   : > { %1579 = vmatpush.bf16.msra.mxu2 %v2820_v8  ;;  %v2817_v8 = vld [vmem:[%s4508_s1 + $0x58] sm:$0xff] }
  0x59   : > { %1490 = vmatpush.bf16.msra.mxu1 %v2812_v18 }
  0x5a   : > { %2485 = vmatmul.msk.bf16.gmra.mxu0 %vm293_vm0, %v2762_v11 }
  0x5b   : > { %2490 = vmatmul.msk.bf16.gmra.mxu1 %vm293_vm0, %v2767_v14 }
  0x5c   : > { %1580 = vmatpush.bf16.msra.mxu2 %v2819_v28  ;;  %v3506_v28 = vld [vmem:[%s4508_s1 + $0xe0] sm:$0xff] }
  0x5d   : > { %1491 = vmatpush.bf16.msra.mxu1 %v2811_v36  ;;  %1759 = vmatpush.bf16.msra.mxu0 %v3506_v28 }
  0x60   : > { %1581 = vmatpush.bf16.msra.mxu2 %v2818_v45 }
  0x64   : > { %1582 = vmatpush.bf16.msra.mxu2 %v2817_v8 }
  0x97   : > { %v351_v52 = vpop.f32.mrf.mxu0 }
  0x98   : > { %v431_v54 = vmax.f32 %v351_v52, 0.0  ;;  %v376_v3 = vpop.f32.mrf.mxu1 }
  0x99   : > { %v441_v32 = vmax.f32 %v376_v3, 0.0 }
  0x9e   : > { %v3426_v20 = vpop.f32.mrf.mxu3 }
  0x9f   : > { %v353_v53 = vpop.f32.mrf.mxu0  ;;  %v3451_v42 = vpop.f32.mrf.mxu2 }
  0xa0   : > { %v432_v55 = vmax.f32 %v353_v53, 0.0  ;;  %v378_v12 = vpop.f32.mrf.mxu1 }
  0xa1   : > { %v442_v33 = vmax.f32 %v378_v12, 0.0 }
  0xa2   : > { %v501_v56 = vpack.c.bf16 %v432_v55, %v431_v54  ;;  %v2826_v55 = vld [vmem:[%s4508_s1 + $0xa0] sm:$0xff] }
  0xa3   : > { %v506_v35 = vpack.c.bf16 %v442_v33, %v441_v32  ;;  %1670 = vmatpush.bf16.msra.mxu3 %v2826_v55 }
  0xa4   : > { %689 = vmatmul.bf16.vlgmr.msrb.gmra.mxu1 %v501_v56  ;;  %778 = vmatmul.bf16.vlgmr.msrb.gmra.mxu2 %v501_v56 }
  0xa5   : > { %867 = vmatmul.bf16.vlgmr.msrb.gmra.mxu3 %v501_v56  ;;  %956 = vmatmul.bf16.vlgmr.msrb.gmra.mxu0 %v501_v56  ;;  %v2810_v56 = vld [vmem:[%s4508_s1 + $0x20] sm:$0xff] }
  0xa6   : > { %v3428_v26 = vpop.f32.mrf.mxu3  ;;  %1492 = vmatpush.bf16.msra.mxu1 %v2810_v56 }
  0xa7   : > { %v356_v58 = vpop.f32.mrf.mxu0  ;;  %v3458_v47 = vpop.f32.mrf.mxu2 }
  0xa8   : > { %v433_v61 = vmax.f32 %v356_v58, 0.0  ;;  %v381_v16 = vpop.f32.mrf.mxu1  ;;  %v495_v58 = vld [vmem:[%s4509_s2 + $0x100] sm:$0x11] }
  0xa9   : > { %v443_v39 = vmax.f32 %v381_v16, 0.0  ;;  %v497_v1 = vunpack.c.l.bf16 %v495_v58  ;;  %v498_v10 = vunpack.c.h.bf16 %v495_v58  ;;  %v2825_v58 = vld [vmem:[%s4508_s1 + $0x98] sm:$0xff] }
  0xaa   : > { %1671 = vmatpush.bf16.msra.mxu3 %v2825_v58 }
  0xae   : > { %v3442_v31 = vpop.f32.mrf.mxu3 }
  0xaf   : > { %v358_v60 = vpop.f32.mrf.mxu0  ;;  %v3470_v54 = vpop.f32.mrf.mxu2 }
  0xb0   : > { %v434_v62 = vmax.f32 %v358_v60, 0.0  ;;  %v383_v21 = vpop.f32.mrf.mxu1 }
  0xb1   : > { %v444_v40 = vmax.f32 %v383_v21, 0.0 }
  0xb2   : > { %v502_v63 = vpack.c.bf16 %v434_v62, %v433_v61 }
  0xb3   : > { %v507_v43 = vpack.c.bf16 %v444_v40, %v443_v39 }
  0xb4   : > { %694 = vmatmul.bf16.gmra.mxu1 %v502_v63  ;;  %783 = vmatmul.bf16.gmra.mxu2 %v502_v63 }
  0xb5   : > { %872 = vmatmul.bf16.gmra.mxu3 %v502_v63  ;;  %961 = vmatmul.bf16.gmra.mxu0 %v502_v63  ;;  %v496_v63 = vld [vmem:[%s4509_s2 + $0x108] sm:$0x11] }
  0xb6   : > { %v3447_v37 = vpop.f32.mrf.mxu3  ;;  %v500_v3 = vunpack.c.h.bf16 %v496_v63  ;;  %v499_v12 = vunpack.c.l.bf16 %v496_v63 }
  0xb7   : > { %v361_v2 = vpop.f32.mrf.mxu0  ;;  %v3486_v0 = vpop.f32.mrf.mxu2 }
  0xb8   : > { %v435_v5 = vmax.f32 %v361_v2, 0.0  ;;  %v386_v27 = vpop.f32.mrf.mxu1  ;;  %v3500_v21 = vperm.slane %v499_v12, 0 }
  0xb9   : > { %v445_v49 = vmax.f32 %v386_v27, 0.0 }
  0xbe   : > { %v3449_v41 = vpop.f32.mrf.mxu3 }
  0xbf   : > { %v363_v4 = vpop.f32.mrf.mxu0 }
  0xc0   : > { %v436_v6 = vmax.f32 %v363_v4, 0.0  ;;  %v388_v34 = vpop.f32.mrf.mxu1 }
  0xc1   : > { %v446_v50 = vmax.f32 %v388_v34, 0.0 }
  0xc2   : > { %v503_v7 = vpack.c.bf16 %v436_v6, %v435_v5  ;;  %v3488_v6 = vperm.slane %v497_v1, 0 }
  0xc3   : > { %v508_v52 = vpack.c.bf16 %v446_v50, %v445_v49 }
  0xc4   : > { %699 = vmatmul.bf16.gmra.mxu1 %v503_v7  ;;  %788 = vmatmul.bf16.gmra.mxu2 %v503_v7 }
  0xc5   : > { %877 = vmatmul.bf16.gmra.mxu3 %v503_v7  ;;  %966 = vmatmul.bf16.gmra.mxu0 %v503_v7  ;;  %v3490_v7 = vperm.slane %v500_v3, 0 }
  0xc6   : > { %v3456_v46 = vpop.f32.mrf.mxu3 }
  0xc7   : > { %v366_v11 = vpop.f32.mrf.mxu0 }
  0xc8   : > { %v437_v14 = vmax.f32 %v366_v11, 0.0  ;;  %v391_v38 = vpop.f32.mrf.mxu1 }
  0xc9   : > { %v447_v60 = vmax.f32 %v391_v38, 0.0 }
  0xce   : > { %v3468_v53 = vpop.f32.mrf.mxu3 }
  0xcf   : > { %v368_v13 = vpop.f32.mrf.mxu0 }
  0xd0   : > { %v438_v15 = vmax.f32 %v368_v13, 0.0  ;;  %v393_v44 = vpop.f32.mrf.mxu1 }
  0xd1   : > { %v448_v61 = vmax.f32 %v393_v44, 0.0 }
  0xd2   : > { %v504_v17 = vpack.c.bf16 %v438_v15, %v437_v14 }
  0xd3   : > { %v509_v4 = vpack.c.bf16 %v448_v61, %v447_v60  ;;  %v2809_v60 = vld [vmem:[%s4508_s1 + $0x18] sm:$0xff] }
  0xd4   : > { %704 = vmatmul.bf16.gmra.mxu1 %v504_v17  ;;  %793 = vmatmul.bf16.gmra.mxu2 %v504_v17 }
  0xd5   : > { %882 = vmatmul.bf16.gmra.mxu3 %v504_v17  ;;  %971 = vmatmul.bf16.gmra.mxu0 %v504_v17  ;;  %v3497_v17 = vperm.slane %v498_v10, 0 }
  0xd6   : > { %v3481_v62 = vpop.f32.mrf.mxu3  ;;  %1493 = vmatpush.bf16.msra.mxu1 %v2809_v60 }
  0xd7   : > { %v371_v19 = vpop.f32.mrf.mxu0 }
  0xd8   : > { %v439_v23 = vmax.f32 %v371_v19, 0.0  ;;  %v3460_v48 = vpop.f32.mrf.mxu1 }
  0xd9   : > { %v449_v30 = vmax.f32 %v3460_v48, 0.0 }
  0xdf   : > { %v373_v22 = vpop.f32.mrf.mxu0 }
  0xe0   : > { %v440_v24 = vmax.f32 %v373_v22, 0.0  ;;  %v398_v57 = vpop.f32.mrf.mxu1 }
  0xe1   : > { %v450_v32 = vmax.f32 %v398_v57, 0.0 }
  0xe2   : > { %v505_v25 = vpack.c.bf16 %v440_v24, %v439_v23 }
  0xe3   : > { %v510_v45 = vpack.c.bf16 %v450_v32, %v449_v30 }
  0xe4   : > { %709 = vmatmul.bf16.gmra.mxu1 %v505_v25  ;;  %798 = vmatmul.bf16.gmra.mxu2 %v505_v25 }
  0xe5   : > { %887 = vmatmul.bf16.gmra.mxu3 %v505_v25  ;;  %976 = vmatmul.bf16.gmra.mxu0 %v505_v25 }
  0xf4   : > { %714 = vmatmul.bf16.gmra.mxu1 %v506_v35  ;;  %803 = vmatmul.bf16.gmra.mxu2 %v506_v35 }
  0xf5   : > { %892 = vmatmul.bf16.gmra.mxu3 %v506_v35  ;;  %981 = vmatmul.bf16.gmra.mxu0 %v506_v35 }
 0x104   : > { %719 = vmatmul.bf16.gmra.mxu1 %v507_v43  ;;  %808 = vmatmul.bf16.gmra.mxu2 %v507_v43 }
 0x105   : > { %897 = vmatmul.bf16.gmra.mxu3 %v507_v43  ;;  %986 = vmatmul.bf16.gmra.mxu0 %v507_v43 }
 0x114   : > { %724 = vmatmul.bf16.gmra.mxu1 %v508_v52  ;;  %813 = vmatmul.bf16.gmra.mxu2 %v508_v52 }
 0x115   : > { %902 = vmatmul.bf16.gmra.mxu3 %v508_v52  ;;  %991 = vmatmul.bf16.gmra.mxu0 %v508_v52 }
 0x121   : > { %v690_v2 = vpop.f32.mrf.mxu1 }
 0x122   : > { %v957_v5 = vpop.f32.mrf.mxu0  ;;  %v691_v13 = vadd.f32 %v690_v2, %v3488_v6 }
 0x123   : > { %v958_v15 = vadd.f32 %v957_v5, %v3490_v7 }
 0x124   : > { %729 = vmatmul.bf16.gmra.mxu1 %v509_v4  ;;  %818 = vmatmul.bf16.gmra.mxu2 %v509_v4  ;;  %v1037_v23 = vmax.f32 %v691_v13, 0.0 }
 0x125   : > { %907 = vmatmul.bf16.gmra.mxu3 %v509_v4  ;;  %996 = vmatmul.bf16.gmra.mxu0 %v509_v4  ;;  %v1040_v25 = vmax.f32 %v958_v15, 0.0  ;;  %v452_v15 = vmax.f32 %v3458_v47, 0.0 }
 0x127   : > { %v779_v11 = vpop.f32.mrf.mxu2 }
 0x128   : > { %v868_v14 = vpop.f32.mrf.mxu3  ;;  %v780_v33 = vadd.f32 %v779_v11, %v3497_v17 }
 0x129   : > { %v692_v16 = vpop.f32.mrf.mxu1  ;;  %v869_v35 = vadd.f32 %v868_v14, %v3500_v21  ;;  %v451_v14 = vmax.f32 %v3451_v42, 0.0 }
 0x12a   : > { %v693_v18 = vadd.f32 %v692_v16, %v3488_v6  ;;  %v959_v19 = vpop.f32.mrf.mxu0  ;;  %v1038_v48 = vmax.f32 %v780_v33, 0.0 }
 0x12b   : > { %v960_v22 = vadd.f32 %v959_v19, %v3490_v7  ;;  %v1039_v52 = vmax.f32 %v869_v35, 0.0  ;;  %v511_v32 = vpack.c.bf16 %v452_v15, %v451_v14 }
 0x12c   : > { %v1041_v24 = vmax.f32 %v693_v18, 0.0 }
 0x12d   : > { %v1044_v27 = vmax.f32 %v960_v22, 0.0 }
 0x12e   : > { %v3510_v34 = vpack.c.bf16 %v1041_v24, %v1037_v23 }
 0x12f   : > { %v3513_v36 = vpack.c.bf16 %v1044_v27, %v1040_v25  ;;  %v781_v38 = vpop.f32.mrf.mxu2 }
 0x130   : > { %v782_v39 = vadd.f32 %v781_v38, %v3497_v17  ;;  %v870_v40 = vpop.f32.mrf.mxu3 }
 0x131   : > { %v871_v43 = vadd.f32 %v870_v40, %v3500_v21  ;;  %v695_v44 = vpop.f32.mrf.mxu1  ;;  %v2816_v40 = vld [vmem:[%s4508_s1 + $0x50] sm:$0xff] }
 0x132   : > { %v1042_v49 = vmax.f32 %v782_v39, 0.0  ;;  %v962_v50 = vpop.f32.mrf.mxu0  ;;  %v696_v63 = vadd.f32 %v695_v44, %v3488_v6  ;;  %1583 = vmatpush.bf16.msra.mxu2 %v2816_v40 }
 0x133   : > { %v1043_v55 = vmax.f32 %v871_v43, 0.0  ;;  %v963_v2 = vadd.f32 %v962_v50, %v3490_v7 }
 0x134   : > { %v3518_v56 = vpack.c.bf16 %v1042_v49, %v1038_v48  ;;  %734 = vmatmul.bf16.gmra.mxu1 %v510_v45  ;;  %823 = vmatmul.bf16.gmra.mxu2 %v510_v45  ;;  %v1045_v10 = vmax.f32 %v696_v63, 0.0 }
 0x135   : > { %v3520_v57 = vpack.c.bf16 %v1043_v55, %v1039_v52  ;;  %912 = vmatmul.bf16.gmra.mxu3 %v510_v45  ;;  %1001 = vmatmul.bf16.gmra.mxu0 %v510_v45  ;;  %v1048_v12 = vmax.f32 %v963_v2, 0.0  ;;  %v3556_v2 = vld [vmem:[%s4508_s1 + $0xd8] sm:$0xff] }
 0x136   : > { %1760 = vmatpush.bf16.msra.mxu0 %v3556_v2 }
 0x137   : > { %v784_v61 = vpop.f32.mrf.mxu2 }
 0x138   : > { %v873_v1 = vpop.f32.mrf.mxu3  ;;  %v785_v16 = vadd.f32 %v784_v61, %v3497_v17 }
 0x139   : > { %v697_v3 = vpop.f32.mrf.mxu1  ;;  %v874_v19 = vadd.f32 %v873_v1, %v3500_v21 }
 0x13a   : > { %v698_v4 = vadd.f32 %v697_v3, %v3488_v6  ;;  %v964_v5 = vpop.f32.mrf.mxu0  ;;  %v1046_v33 = vmax.f32 %v785_v16, 0.0  ;;  %v453_v3 = vmax.f32 %v3470_v54, 0.0 }
 0x13b   : > { %v965_v8 = vadd.f32 %v964_v5, %v3490_v7  ;;  %v1047_v47 = vmax.f32 %v874_v19, 0.0 }
 0x13c   : > { %v1049_v11 = vmax.f32 %v698_v4, 0.0  ;;  %v454_v4 = vmax.f32 %v3486_v0, 0.0 }
 0x13d   : > { %v1052_v13 = vmax.f32 %v965_v8, 0.0 }
 0x13e   : > { %v3535_v18 = vpack.c.bf16 %v1049_v11, %v1045_v10  ;;  %v512_v54 = vpack.c.bf16 %v454_v4, %v453_v3 }
 0x13f   : > { %v786_v22 = vpop.f32.mrf.mxu2  ;;  %v3538_v23 = vpack.c.bf16 %v1052_v13, %v1048_v12 }
 0x140   : > { %v787_v24 = vadd.f32 %v786_v22, %v3497_v17  ;;  %v875_v25 = vpop.f32.mrf.mxu3 }
 0x141   : > { %v876_v27 = vadd.f32 %v875_v25, %v3500_v21  ;;  %v700_v30 = vpop.f32.mrf.mxu1 }
 0x142   : > { %v1050_v42 = vmax.f32 %v787_v24, 0.0  ;;  %v967_v35 = vpop.f32.mrf.mxu0  ;;  %v701_v45 = vadd.f32 %v700_v30, %v3488_v6  ;;  %v2824_v30 = vld [vmem:[%s4508_s1 + $0x90] sm:$0xff] }
 0x143   : > { %v1051_v38 = vmax.f32 %v876_v27, 0.0  ;;  %v968_v49 = vadd.f32 %v967_v35, %v3490_v7  ;;  %1672 = vmatpush.bf16.msra.mxu3 %v2824_v30 }
 0x144   : > { %739 = vmatmul.bf16.gmra.mxu1 %v511_v32  ;;  %828 = vmatmul.bf16.gmra.mxu2 %v511_v32  ;;  %v3542_v39 = vpack.c.bf16 %v1050_v42, %v1046_v33  ;;  %v1053_v60 = vmax.f32 %v701_v45, 0.0 }
 0x145   : > { %917 = vmatmul.bf16.gmra.mxu3 %v511_v32  ;;  %1006 = vmatmul.bf16.gmra.mxu0 %v511_v32  ;;  %v3547_v43 = vpack.c.bf16 %v1051_v38, %v1047_v47  ;;  %v1056_v63 = vmax.f32 %v968_v49, 0.0  ;;  %v2808_v32 = vld [vmem:[%s4508_s1 + $0x10] sm:$0xff] }
 0x146   : > { %1494 = vmatpush.bf16.msra.mxu1 %v2808_v32 }
 0x147   : > { %v789_v44 = vpop.f32.mrf.mxu2 }
 0x148   : > { %v878_v48 = vpop.f32.mrf.mxu3  ;;  %v790_v5 = vadd.f32 %v789_v44, %v3497_v17 }
 0x149   : > { %v702_v50 = vpop.f32.mrf.mxu1  ;;  %v879_v10 = vadd.f32 %v878_v48, %v3500_v21 }
 0x14a   : > { %v703_v52 = vadd.f32 %v702_v50, %v3488_v6  ;;  %v969_v55 = vpop.f32.mrf.mxu0  ;;  %v1054_v19 = vmax.f32 %v790_v5, 0.0 }
 0x14b   : > { %v970_v58 = vadd.f32 %v969_v55, %v3490_v7  ;;  %v1055_v24 = vmax.f32 %v879_v10, 0.0 }
 0x14c   : > { %v1057_v61 = vmax.f32 %v703_v52, 0.0 }
 0x14d   : > { %v1060_v1 = vmax.f32 %v970_v58, 0.0  ;;  %v455_v58 = vmax.f32 %v3426_v20, 0.0 }
 0x14e   : > { %v3561_v8 = vpack.c.bf16 %v1057_v61, %v1053_v60  ;;  %v456_v60 = vmax.f32 %v3428_v26, 0.0 }
 0x14f   : > { %v791_v11 = vpop.f32.mrf.mxu2  ;;  %v3565_v12 = vpack.c.bf16 %v1060_v1, %v1056_v63 }
 0x150   : > { %v792_v13 = vadd.f32 %v791_v11, %v3497_v17  ;;  %v880_v14 = vpop.f32.mrf.mxu3 }
 0x151   : > { %v881_v15 = vadd.f32 %v880_v14, %v3500_v21  ;;  %v705_v16 = vpop.f32.mrf.mxu1  ;;  %v513_v14 = vpack.c.bf16 %v456_v60, %v455_v58 }
 0x152   : > { %v1058_v0 = vmax.f32 %v792_v13, 0.0  ;;  %v972_v22 = vpop.f32.mrf.mxu0  ;;  %v706_v35 = vadd.f32 %v705_v16, %v3488_v6 }
 0x153   : > { %v1059_v25 = vmax.f32 %v881_v15, 0.0  ;;  %v973_v38 = vadd.f32 %v972_v22, %v3490_v7 }
 0x154   : > { %744 = vmatmul.bf16.gmra.mxu1 %v512_v54  ;;  %833 = vmatmul.bf16.gmra.mxu2 %v512_v54  ;;  %v3569_v27 = vpack.c.bf16 %v1058_v0, %v1054_v19  ;;  %v1061_v49 = vmax.f32 %v706_v35, 0.0  ;;  %v2815_v0 = vld [vmem:[%s4508_s1 + $0x48] sm:$0xff] }
 0x155   : > { %922 = vmatmul.bf16.gmra.mxu3 %v512_v54  ;;  %1011 = vmatmul.bf16.gmra.mxu0 %v512_v54  ;;  %v3577_v33 = vpack.c.bf16 %v1059_v25, %v1055_v24  ;;  %v1064_v52 = vmax.f32 %v973_v38, 0.0 }
 0x156   : > { %1584 = vmatpush.bf16.msra.mxu2 %v2815_v0 }
 0x157   : > { %v794_v42 = vpop.f32.mrf.mxu2 }
 0x158   : > { %v883_v47 = vpop.f32.mrf.mxu3  ;;  %v795_v61 = vadd.f32 %v794_v42, %v3497_v17 }
 0x159   : > { %v707_v40 = vpop.f32.mrf.mxu1  ;;  %v884_v1 = vadd.f32 %v883_v47, %v3500_v21 }
 0x15a   : > { %v708_v44 = vadd.f32 %v707_v40, %v3488_v6  ;;  %v974_v45 = vpop.f32.mrf.mxu0  ;;  %v1062_v15 = vmax.f32 %v795_v61, 0.0  ;;  %2843 = vmatpush.bf16.msrb.mxu2 %v3402_v59  ;;  %v457_v59 = vmax.f32 %v3442_v31, 0.0 }
 0x15b   : > { %v975_v48 = vadd.f32 %v974_v45, %v3490_v7  ;;  %v1063_v26 = vmax.f32 %v884_v1, 0.0 }
 0x15c   : > { %v1065_v50 = vmax.f32 %v708_v44, 0.0 }
 0x15d   : > { %v1068_v55 = vmax.f32 %v975_v48, 0.0 }
 0x15e   : > { %v3586_v63 = vpack.c.bf16 %v1065_v50, %v1061_v49  ;;  %2844 = vmatpush.bf16.msrb.mxu2 %v3417_v9  ;;  %v2832_v49 = vld [vmem:[%s4508_s1 + $0xd0] sm:$0xff]  ;;  %v458_v50 = vmax.f32 %v3447_v37, 0.0 }
 0x15f   : > { %v796_v3 = vpop.f32.mrf.mxu2  ;;  %v3589_v4 = vpack.c.bf16 %v1068_v55, %v1064_v52  ;;  %1761 = vmatpush.bf16.msra.mxu0 %v2832_v49 }
 0x160   : > { %v797_v5 = vadd.f32 %v796_v3, %v3497_v17  ;;  %v885_v10 = vpop.f32.mrf.mxu3 }
 0x161   : > { %v886_v11 = vadd.f32 %v885_v10, %v3500_v21  ;;  %v710_v13 = vpop.f32.mrf.mxu1 }
 0x162   : > { %v1066_v20 = vmax.f32 %v797_v5, 0.0  ;;  %v977_v16 = vpop.f32.mrf.mxu0  ;;  %v711_v25 = vadd.f32 %v710_v13, %v3488_v6  ;;  %2845 = vmatpush.bf16.msrb.mxu2 %v3436_v29  ;;  %v514_v5 = vpack.c.bf16 %v458_v50, %v457_v59  ;;  %v2807_v29 = vld [vmem:[%s4508_s1 + $0x8] sm:$0xff] }
 0x163   : > { %v1067_v54 = vmax.f32 %v886_v11, 0.0  ;;  %v978_v32 = vadd.f32 %v977_v16, %v3490_v7  ;;  %1495 = vmatpush.bf16.msra.mxu1 %v2807_v29 }
 0x164   : > { %749 = vmatmul.bf16.gmra.mxu1 %v513_v14  ;;  %838 = vmatmul.bf16.gmra.mxu2 %v513_v14  ;;  %v3593_v19 = vpack.c.bf16 %v1066_v20, %v1062_v15  ;;  %v1069_v40 = vmax.f32 %v711_v25, 0.0  ;;  %v2823_v20 = vld [vmem:[%s4508_s1 + $0x88] sm:$0xff] }
 0x165   : > { %927 = vmatmul.bf16.gmra.mxu3 %v513_v14  ;;  %1016 = vmatmul.bf16.gmra.mxu0 %v513_v14  ;;  %v3598_v22 = vpack.c.bf16 %v1067_v54, %v1063_v26  ;;  %v1072_v45 = vmax.f32 %v978_v32, 0.0 }
 0x166   : > { %2846 = vmatpush.bf16.msrb.mxu2 %v3465_v51  ;;  %1673 = vmatpush.bf16.msra.mxu3 %v2823_v20 }
 0x167   : > { %v799_v24 = vpop.f32.mrf.mxu2 }
 0x168   : > { %v888_v30 = vpop.f32.mrf.mxu3  ;;  %v800_v52 = vadd.f32 %v799_v24, %v3497_v17 }
 0x169   : > { %v712_v42 = vpop.f32.mrf.mxu1  ;;  %v889_v58 = vadd.f32 %v888_v30, %v3500_v21 }
 0x16a   : > { %v713_v35 = vadd.f32 %v712_v42, %v3488_v6  ;;  %v979_v47 = vpop.f32.mrf.mxu0  ;;  %v1070_v37 = vmax.f32 %v800_v52, 0.0  ;;  %2847 = vmatpush.bf16.msrb.mxu2 %v3506_v28 }
 0x16b   : > { %v980_v38 = vadd.f32 %v979_v47, %v3490_v7  ;;  %v1071_v13 = vmax.f32 %v889_v58, 0.0 }
 0x16c   : > { %v1073_v44 = vmax.f32 %v713_v35, 0.0 }
 0x16d   : > { %v1076_v48 = vmax.f32 %v980_v38, 0.0 }
 0x16e   : > { %v3612_v55 = vpack.c.bf16 %v1073_v44, %v1069_v40  ;;  %v459_v40 = vmax.f32 %v3449_v41, 0.0  ;;  %v460_v44 = vmax.f32 %v3456_v46, 0.0  ;;  %2848 = vmatpush.bf16.msrb.mxu2 %v3556_v2  ;;  %v2831_v41 = vld [vmem:[%s4508_s1 + $0xc8] sm:$0xff] }
 0x16f   : > { %v801_v60 = vpop.f32.mrf.mxu2  ;;  %v3615_v61 = vpack.c.bf16 %v1076_v48, %v1072_v45  ;;  %1762 = vmatpush.bf16.msra.mxu0 %v2831_v41 }
 0x170   : > { %v802_v9 = vadd.f32 %v801_v60, %v3497_v17  ;;  %v890_v1 = vpop.f32.mrf.mxu3 }
 0x171   : > { %v891_v3 = vadd.f32 %v890_v1, %v3500_v21  ;;  %v715_v31 = vpop.f32.mrf.mxu1 }
 0x172   : > { %v1074_v10 = vmax.f32 %v802_v9, 0.0  ;;  %v982_v11 = vpop.f32.mrf.mxu0  ;;  %v716_v54 = vadd.f32 %v715_v31, %v3488_v6  ;;  %v515_v9 = vpack.c.bf16 %v460_v44, %v459_v40  ;;  %2849 = vmatpush.bf16.msrb.mxu2 %v2832_v49 }
 0x173   : > { %v1075_v14 = vmax.f32 %v891_v3, 0.0  ;;  %v983_v24 = vadd.f32 %v982_v11, %v3490_v7 }
 0x174   : > { %754 = vmatmul.bf16.gmra.mxu1 %v514_v5  ;;  %843 = vmatmul.bf16.gmra.mxu2 %v514_v5  ;;  %v3620_v15 = vpack.c.bf16 %v1074_v10, %v1070_v37  ;;  %v1077_v35 = vmax.f32 %v716_v54, 0.0 }
 0x175   : > { %932 = vmatmul.bf16.gmra.mxu3 %v514_v5  ;;  %1021 = vmatmul.bf16.gmra.mxu0 %v514_v5  ;;  %v3628_v16 = vpack.c.bf16 %v1075_v14, %v1071_v13  ;;  %v1080_v38 = vmax.f32 %v983_v24, 0.0 }
 0x176   : > { %2850 = vmatpush.bf16.msrb.mxu2 %v2831_v41 }
 0x177   : > { %v804_v26 = vpop.f32.mrf.mxu2 }
 0x178   : > { %v893_v0 = vpop.f32.mrf.mxu3  ;;  %v805_v45 = vadd.f32 %v804_v26, %v3497_v17 }
 0x179   : > { %v717_v25 = vpop.f32.mrf.mxu1  ;;  %v894_v59 = vadd.f32 %v893_v0, %v3500_v21 }
 0x17a   : > { %v718_v30 = vadd.f32 %v717_v25, %v3488_v6  ;;  %v984_v32 = vpop.f32.mrf.mxu0  ;;  %v1078_v1 = vmax.f32 %v805_v45, 0.0 }
 0x17b   : > { %v985_v42 = vadd.f32 %v984_v32, %v3490_v7  ;;  %v1079_v2 = vmax.f32 %v894_v59, 0.0  ;;  %v461_v32 = vmax.f32 %v3468_v53, 0.0 }
 0x17c   : > { %v1081_v47 = vmax.f32 %v718_v30, 0.0 }
 0x17d   : > { %v1084_v51 = vmax.f32 %v985_v42, 0.0  ;;  %v462_v42 = vmax.f32 %v3481_v62, 0.0 }
 0x17e   : > { %v3639_v48 = vpack.c.bf16 %v1081_v47, %v1077_v35 }
 0x17f   : > { %v806_v50 = vpop.f32.mrf.mxu2  ;;  %v3643_v28 = vpack.c.bf16 %v1084_v51, %v1080_v38 }
 0x180   : > { %v807_v52 = vadd.f32 %v806_v50, %v3497_v17  ;;  %v895_v58 = vpop.f32.mrf.mxu3 }
 0x181   : > { %v896_v46 = vadd.f32 %v895_v58, %v3500_v21  ;;  %v720_v60 = vpop.f32.mrf.mxu1 }
 0x182   : > { %v1082_v3 = vmax.f32 %v807_v52, 0.0  ;;  %v987_v31 = vpop.f32.mrf.mxu0  ;;  %v721_v13 = vadd.f32 %v720_v60, %v3488_v6  ;;  %v516_v52 = vpack.c.bf16 %v462_v42, %v461_v32 }
 0x183   : > { %v1083_v5 = vmax.f32 %v896_v46, 0.0  ;;  %v988_v20 = vadd.f32 %v987_v31, %v3490_v7 }
 0x184   : > { %759 = vmatmul.bf16.gmra.mxu1 %v515_v9  ;;  %848 = vmatmul.bf16.gmra.mxu2 %v515_v9  ;;  %v3650_v37 = vpack.c.bf16 %v1082_v3, %v1078_v1  ;;  %v1085_v0 = vmax.f32 %v721_v13, 0.0 }
 0x185   : > { %937 = vmatmul.bf16.gmra.mxu3 %v515_v9  ;;  %1026 = vmatmul.bf16.gmra.mxu0 %v515_v9  ;;  %v3652_v10 = vpack.c.bf16 %v1083_v5, %v1079_v2  ;;  %v1088_v25 = vmax.f32 %v988_v20, 0.0 }
 0x187   : > { %v809_v11 = vpop.f32.mrf.mxu2 }
 0x188   : > { %v898_v14 = vpop.f32.mrf.mxu3  ;;  %v810_v35 = vadd.f32 %v809_v11, %v3497_v17 }
 0x189   : > { %v722_v29 = vpop.f32.mrf.mxu1  ;;  %v899_v38 = vadd.f32 %v898_v14, %v3500_v21 }
 0x18a   : > { %v723_v49 = vadd.f32 %v722_v29, %v3488_v6  ;;  %v989_v26 = vpop.f32.mrf.mxu0  ;;  %v1086_v58 = vmax.f32 %v810_v35, 0.0 }
 0x18b   : > { %v990_v54 = vadd.f32 %v989_v26, %v3490_v7  ;;  %v1087_v62 = vmax.f32 %v899_v38, 0.0 }
 0x18c   : > { %v1089_v24 = vmax.f32 %v723_v49, 0.0 }
 0x18d   : > { %v1092_v30 = vmax.f32 %v990_v54, 0.0 }
 0x18e   : > { %v3661_v47 = vpack.c.bf16 %v1089_v24, %v1085_v0 }
 0x18f   : > { %v811_v51 = vpop.f32.mrf.mxu2  ;;  %v3664_v40 = vpack.c.bf16 %v1092_v30, %v1088_v25 }
 0x190   : > { %v812_v44 = vadd.f32 %v811_v51, %v3497_v17  ;;  %v900_v45 = vpop.f32.mrf.mxu3 }
 0x191   : > { %v901_v59 = vadd.f32 %v900_v45, %v3500_v21  ;;  %v725_v50 = vpop.f32.mrf.mxu1 }
 0x192   : > { %v1090_v53 = vmax.f32 %v812_v44, 0.0  ;;  %v992_v41 = vpop.f32.mrf.mxu0  ;;  %v726_v3 = vadd.f32 %v725_v50, %v3488_v6 }
 0x193   : > { %v1091_v46 = vmax.f32 %v901_v59, 0.0  ;;  %v993_v2 = vadd.f32 %v992_v41, %v3490_v7 }
 0x194   : > { %764 = vmatmul.bf16.gmra.mxu1 %v516_v52  ;;  %853 = vmatmul.bf16.gmra.mxu2 %v516_v52  ;;  %v3668_v60 = vpack.c.bf16 %v1090_v53, %v1086_v58  ;;  %v1093_v20 = vmax.f32 %v726_v3, 0.0 }
 0x195   : > { %942 = vmatmul.bf16.gmra.mxu3 %v516_v52  ;;  %1031 = vmatmul.bf16.gmra.mxu0 %v516_v52  ;;  %v3670_v9 = vpack.c.bf16 %v1091_v46, %v1087_v62  ;;  %v1096_v49 = vmax.f32 %v993_v2, 0.0 }
 0x197   : > { %v814_v1 = vpop.f32.mrf.mxu2 }
 0x198   : > { %v903_v31 = vpop.f32.mrf.mxu3  ;;  %v815_v54 = vadd.f32 %v814_v1, %v3497_v17 }
 0x199   : > { %v727_v5 = vpop.f32.mrf.mxu1  ;;  %v904_v24 = vadd.f32 %v903_v31, %v3500_v21 }
 0x19a   : > { %v728_v11 = vadd.f32 %v727_v5, %v3488_v6  ;;  %v994_v13 = vpop.f32.mrf.mxu0  ;;  %v1094_v51 = vmax.f32 %v815_v54, 0.0 }
 0x19b   : > { %v995_v14 = vadd.f32 %v994_v13, %v3490_v7  ;;  %v1095_v59 = vmax.f32 %v904_v24, 0.0 }
 0x19c   : > { %v1097_v29 = vmax.f32 %v728_v11, 0.0 }
 0x19d   : > { %v1100_v26 = vmax.f32 %v995_v14, 0.0 }
 0x19e   : > { %v3677_v0 = vpack.c.bf16 %v1097_v29, %v1093_v20 }
 0x19f   : > { %v816_v25 = vpop.f32.mrf.mxu2  ;;  %v3680_v30 = vpack.c.bf16 %v1100_v26, %v1096_v49 }
 0x1a0   : > { %v817_v32 = vadd.f32 %v816_v25, %v3497_v17  ;;  %v905_v42 = vpop.f32.mrf.mxu3 }
 0x1a1   : > { %v906_v35 = vadd.f32 %v905_v42, %v3500_v21  ;;  %v730_v38 = vpop.f32.mrf.mxu1 }
 0x1a2   : > { %v1098_v44 = vmax.f32 %v817_v32, 0.0  ;;  %v997_v45 = vpop.f32.mrf.mxu0  ;;  %v731_v41 = vadd.f32 %v730_v38, %v3488_v6 }
 0x1a3   : > { %v1099_v50 = vmax.f32 %v906_v35, 0.0  ;;  %v998_v46 = vadd.f32 %v997_v45, %v3490_v7 }
 0x1a4   : > { %1496 = vmatmul.bf16.vlgmr.msra.gmra.mxu1 %v3510_v34  ;;  %1585 = vmatmul.bf16.vlgmr.msra.gmra.mxu2 %v3518_v56  ;;  %v3686_v52 = vpack.c.bf16 %v1098_v44, %v1094_v51  ;;  %v1101_v31 = vmax.f32 %v731_v41, 0.0 }
 0x1a5   : > { %1674 = vmatmul.bf16.vlgmr.msra.gmra.mxu3 %v3520_v57  ;;  %1763 = vmatmul.bf16.vlgmr.msra.gmra.mxu0 %v3513_v36  ;;  %v3690_v58 = vpack.c.bf16 %v1099_v50, %v1095_v59  ;;  %v1104_v5 = vmax.f32 %v998_v46, 0.0 }
 0x1a7   : > { %v819_v53 = vpop.f32.mrf.mxu2 }
 0x1a8   : > { %v908_v62 = vpop.f32.mrf.mxu3  ;;  %v820_v36 = vadd.f32 %v819_v53, %v3497_v17 }
 0x1a9   : > { %v732_v1 = vpop.f32.mrf.mxu1  ;;  %v909_v13 = vadd.f32 %v908_v62, %v3500_v21 }
 0x1aa   : > { %v733_v3 = vadd.f32 %v732_v1, %v3488_v6  ;;  %v999_v34 = vpop.f32.mrf.mxu0  ;;  %v1102_v24 = vmax.f32 %v820_v36, 0.0 }
 0x1ab   : > { %v1000_v56 = vadd.f32 %v999_v34, %v3490_v7  ;;  %v1103_v42 = vmax.f32 %v909_v13, 0.0 }
 0x1ac   : > { %v1105_v2 = vmax.f32 %v733_v3, 0.0 }
 0x1ad   : > { %v1108_v57 = vmax.f32 %v1000_v56, 0.0 }
 0x1ae   : > { %v3697_v11 = vpack.c.bf16 %v1105_v2, %v1101_v31 }
 0x1af   : > { %v821_v14 = vpop.f32.mrf.mxu2  ;;  %v3700_v20 = vpack.c.bf16 %v1108_v57, %v1104_v5 }
 0x1b0   : > { %v822_v29 = vadd.f32 %v821_v14, %v3497_v17  ;;  %v910_v49 = vpop.f32.mrf.mxu3 }
 0x1b1   : > { %v911_v26 = vadd.f32 %v910_v49, %v3500_v21  ;;  %v735_v54 = vpop.f32.mrf.mxu1 }
 0x1b2   : > { %v1106_v25 = vmax.f32 %v822_v29, 0.0  ;;  %v1002_v32 = vpop.f32.mrf.mxu0  ;;  %v736_v45 = vadd.f32 %v735_v54, %v3488_v6 }
 0x1b3   : > { %v1107_v35 = vmax.f32 %v911_v26, 0.0  ;;  %v1003_v50 = vadd.f32 %v1002_v32, %v3490_v7 }
 0x1b4   : > { %1501 = vmatmul.bf16.gmra.mxu1 %v3535_v18  ;;  %1590 = vmatmul.bf16.gmra.mxu2 %v3542_v39  ;;  %v3706_v38 = vpack.c.bf16 %v1106_v25, %v1102_v24  ;;  %v1109_v62 = vmax.f32 %v736_v45, 0.0 }
 0x1b5   : > { %1679 = vmatmul.bf16.gmra.mxu3 %v3547_v43  ;;  %1768 = vmatmul.bf16.gmra.mxu0 %v3538_v23  ;;  %v3710_v51 = vpack.c.bf16 %v1107_v35, %v1103_v42  ;;  %v1112_v1 = vmax.f32 %v1003_v50, 0.0 }
 0x1b7   : > { %v824_v44 = vpop.f32.mrf.mxu2 }
 0x1b8   : > { %v913_v59 = vpop.f32.mrf.mxu3  ;;  %v825_v23 = vadd.f32 %v824_v44, %v3497_v17 }
 0x1b9   : > { %v737_v53 = vpop.f32.mrf.mxu1  ;;  %v914_v34 = vadd.f32 %v913_v59, %v3500_v21 }
 0x1ba   : > { %v738_v41 = vadd.f32 %v737_v53, %v3488_v6  ;;  %v1004_v18 = vpop.f32.mrf.mxu0  ;;  %v1110_v13 = vmax.f32 %v825_v23, 0.0 }
 0x1bb   : > { %v1005_v39 = vadd.f32 %v1004_v18, %v3490_v7  ;;  %v1111_v49 = vmax.f32 %v914_v34, 0.0 }
 0x1bc   : > { %v1113_v46 = vmax.f32 %v738_v41, 0.0 }
 0x1bd   : > { %v1116_v43 = vmax.f32 %v1005_v39, 0.0 }
 0x1be   : > { %v3717_v3 = vpack.c.bf16 %v1113_v46, %v1109_v62 }
 0x1bf   : > { %v826_v56 = vpop.f32.mrf.mxu2  ;;  %v3720_v31 = vpack.c.bf16 %v1116_v43, %v1112_v1 }
 0x1c0   : > { %v827_v2 = vadd.f32 %v826_v56, %v3497_v17  ;;  %v915_v5 = vpop.f32.mrf.mxu3 }
 0x1c1   : > { %v916_v57 = vadd.f32 %v915_v5, %v3500_v21  ;;  %v740_v36 = vpop.f32.mrf.mxu1 }
 0x1c2   : > { %v1114_v14 = vmax.f32 %v827_v2, 0.0  ;;  %v1007_v29 = vpop.f32.mrf.mxu0  ;;  %v741_v32 = vadd.f32 %v740_v36, %v3488_v6 }
 0x1c3   : > { %v1115_v26 = vmax.f32 %v916_v57, 0.0  ;;  %v1008_v35 = vadd.f32 %v1007_v29, %v3490_v7 }
 0x1c4   : > { %1506 = vmatmul.bf16.gmra.mxu1 %v3561_v8  ;;  %1595 = vmatmul.bf16.gmra.mxu2 %v3569_v27  ;;  %v3726_v54 = vpack.c.bf16 %v1114_v14, %v1110_v13  ;;  %v1117_v59 = vmax.f32 %v741_v32, 0.0 }
 0x1c5   : > { %1684 = vmatmul.bf16.gmra.mxu3 %v3577_v33  ;;  %1773 = vmatmul.bf16.gmra.mxu0 %v3565_v12  ;;  %v3730_v24 = vpack.c.bf16 %v1115_v26, %v1111_v49  ;;  %v1120_v53 = vmax.f32 %v1008_v35, 0.0 }
 0x1c7   : > { %v829_v25 = vpop.f32.mrf.mxu2 }
 0x1c8   : > { %v918_v42 = vpop.f32.mrf.mxu3  ;;  %v830_v12 = vadd.f32 %v829_v25, %v3497_v17 }
 0x1c9   : > { %v742_v44 = vpop.f32.mrf.mxu1  ;;  %v919_v18 = vadd.f32 %v918_v42, %v3500_v21 }
 0x1ca   : > { %v743_v45 = vadd.f32 %v742_v44, %v3488_v6  ;;  %v1009_v8 = vpop.f32.mrf.mxu0  ;;  %v1118_v34 = vmax.f32 %v830_v12, 0.0 }
 0x1cb   : > { %v1010_v27 = vadd.f32 %v1009_v8, %v3490_v7  ;;  %v1119_v5 = vmax.f32 %v919_v18, 0.0 }
 0x1cc   : > { %v1121_v50 = vmax.f32 %v743_v45, 0.0 }
 0x1cd   : > { %v1124_v33 = vmax.f32 %v1010_v27, 0.0 }
 0x1ce   : > { %v3737_v41 = vpack.c.bf16 %v1121_v50, %v1117_v59 }
 0x1cf   : > { %v831_v39 = vpop.f32.mrf.mxu2  ;;  %v3740_v62 = vpack.c.bf16 %v1124_v33, %v1120_v53 }
 0x1d0   : > { %v832_v46 = vadd.f32 %v831_v39, %v3497_v17  ;;  %v920_v1 = vpop.f32.mrf.mxu3 }
 0x1d1   : > { %v921_v43 = vadd.f32 %v920_v1, %v3500_v21  ;;  %v745_v23 = vpop.f32.mrf.mxu1 }
 0x1d2   : > { %v1122_v56 = vmax.f32 %v832_v46, 0.0  ;;  %v1012_v2 = vpop.f32.mrf.mxu0  ;;  %v746_v29 = vadd.f32 %v745_v23, %v3488_v6 }
 0x1d3   : > { %v1123_v57 = vmax.f32 %v921_v43, 0.0  ;;  %v1013_v26 = vadd.f32 %v1012_v2, %v3490_v7 }
 0x1d4   : > { %1511 = vmatmul.bf16.gmra.mxu1 %v3586_v63  ;;  %1600 = vmatmul.bf16.gmra.mxu2 %v3593_v19  ;;  %v3746_v36 = vpack.c.bf16 %v1122_v56, %v1118_v34  ;;  %v1125_v42 = vmax.f32 %v746_v29, 0.0 }
 0x1d5   : > { %1689 = vmatmul.bf16.gmra.mxu3 %v3598_v22  ;;  %1778 = vmatmul.bf16.gmra.mxu0 %v3589_v4  ;;  %v3750_v13 = vpack.c.bf16 %v1123_v57, %v1119_v5  ;;  %v1128_v44 = vmax.f32 %v1013_v26, 0.0 }
 0x1d7   : > { %v834_v14 = vpop.f32.mrf.mxu2 }
 0x1d8   : > { %v923_v49 = vpop.f32.mrf.mxu3  ;;  %v835_v4 = vadd.f32 %v834_v14, %v3497_v17 }
 0x1d9   : > { %v747_v25 = vpop.f32.mrf.mxu1  ;;  %v924_v8 = vadd.f32 %v923_v49, %v3500_v21 }
 0x1da   : > { %v748_v32 = vadd.f32 %v747_v25, %v3488_v6  ;;  %v1014_v63 = vpop.f32.mrf.mxu0  ;;  %v1126_v18 = vmax.f32 %v835_v4, 0.0 }
 0x1db   : > { %v1015_v19 = vadd.f32 %v1014_v63, %v3490_v7  ;;  %v1127_v1 = vmax.f32 %v924_v8, 0.0 }
 0x1dc   : > { %v1129_v35 = vmax.f32 %v748_v32, 0.0 }
 0x1dd   : > { %v1132_v22 = vmax.f32 %v1015_v19, 0.0 }
 0x1de   : > { %v3757_v45 = vpack.c.bf16 %v1129_v35, %v1125_v42 }
 0x1df   : > { %v836_v27 = vpop.f32.mrf.mxu2  ;;  %v3760_v59 = vpack.c.bf16 %v1132_v22, %v1128_v44 }
 0x1e0   : > { %v837_v50 = vadd.f32 %v836_v27, %v3497_v17  ;;  %v925_v53 = vpop.f32.mrf.mxu3 }
 0x1e1   : > { %v926_v33 = vadd.f32 %v925_v53, %v3500_v21  ;;  %v750_v12 = vpop.f32.mrf.mxu1 }
 0x1e2   : > { %v1130_v39 = vmax.f32 %v837_v50, 0.0  ;;  %v1017_v46 = vpop.f32.mrf.mxu0  ;;  %v751_v2 = vadd.f32 %v750_v12, %v3488_v6 }
 0x1e3   : > { %v1131_v43 = vmax.f32 %v926_v33, 0.0  ;;  %v1018_v57 = vadd.f32 %v1017_v46, %v3490_v7 }
 0x1e4   : > { %1516 = vmatmul.bf16.gmra.mxu1 %v3612_v55  ;;  %1605 = vmatmul.bf16.gmra.mxu2 %v3620_v15  ;;  %v3766_v23 = vpack.c.bf16 %v1130_v39, %v1126_v18  ;;  %v1133_v49 = vmax.f32 %v751_v2, 0.0 }
 0x1e5   : > { %1694 = vmatmul.bf16.gmra.mxu3 %v3628_v16  ;;  %1783 = vmatmul.bf16.gmra.mxu0 %v3615_v61  ;;  %v3770_v34 = vpack.c.bf16 %v1131_v43, %v1127_v1  ;;  %v1136_v25 = vmax.f32 %v1018_v57, 0.0 }
 0x1e7   : > { %v839_v56 = vpop.f32.mrf.mxu2 }
 0x1e8   : > { %v928_v5 = vpop.f32.mrf.mxu3  ;;  %v840_v61 = vadd.f32 %v839_v56, %v3497_v17 }
 0x1e9   : > { %v752_v14 = vpop.f32.mrf.mxu1  ;;  %v929_v63 = vadd.f32 %v928_v5, %v3500_v21 }
 0x1ea   : > { %v753_v29 = vadd.f32 %v752_v14, %v3488_v6  ;;  %v1019_v55 = vpop.f32.mrf.mxu0  ;;  %v1134_v8 = vmax.f32 %v840_v61, 0.0 }
 0x1eb   : > { %v1020_v15 = vadd.f32 %v1019_v55, %v3490_v7  ;;  %v1135_v53 = vmax.f32 %v929_v63, 0.0 }
 0x1ec   : > { %v1137_v26 = vmax.f32 %v753_v29, 0.0 }
 0x1ed   : > { %v1140_v16 = vmax.f32 %v1020_v15, 0.0 }
 0x1ee   : > { %v3777_v32 = vpack.c.bf16 %v1137_v26, %v1133_v49 }
 0x1ef   : > { %v841_v19 = vpop.f32.mrf.mxu2  ;;  %v3780_v42 = vpack.c.bf16 %v1140_v16, %v1136_v25 }
 0x1f0   : > { %v842_v35 = vadd.f32 %v841_v19, %v3497_v17  ;;  %v930_v44 = vpop.f32.mrf.mxu3 }
 0x1f1   : > { %v931_v22 = vadd.f32 %v930_v44, %v3500_v21  ;;  %v755_v4 = vpop.f32.mrf.mxu1 }
 0x1f2   : > { %v1138_v27 = vmax.f32 %v842_v35, 0.0  ;;  %v1022_v50 = vpop.f32.mrf.mxu0  ;;  %v756_v46 = vadd.f32 %v755_v4, %v3488_v6 }
 0x1f3   : > { %v1139_v33 = vmax.f32 %v931_v22, 0.0  ;;  %v1023_v43 = vadd.f32 %v1022_v50, %v3490_v7 }
 0x1f4   : > { %1521 = vmatmul.bf16.gmra.mxu1 %v3639_v48  ;;  %1610 = vmatmul.bf16.gmra.mxu2 %v3650_v37  ;;  %v3786_v12 = vpack.c.bf16 %v1138_v27, %v1134_v8  ;;  %v1141_v5 = vmax.f32 %v756_v46, 0.0 }
 0x1f5   : > { %1699 = vmatmul.bf16.gmra.mxu3 %v3652_v10  ;;  %1788 = vmatmul.bf16.gmra.mxu0 %v3643_v28  ;;  %v3790_v18 = vpack.c.bf16 %v1139_v33, %v1135_v53  ;;  %v1144_v14 = vmax.f32 %v1023_v43, 0.0 }
 0x1f7   : > { %v844_v39 = vpop.f32.mrf.mxu2 }
 0x1f8   : > { %v933_v1 = vpop.f32.mrf.mxu3  ;;  %v845_v28 = vadd.f32 %v844_v39, %v3497_v17 }
 0x1f9   : > { %v757_v56 = vpop.f32.mrf.mxu1  ;;  %v934_v55 = vadd.f32 %v933_v1, %v3500_v21 }
 0x1fa   : > { %v758_v2 = vadd.f32 %v757_v56, %v3488_v6  ;;  %v1024_v48 = vpop.f32.mrf.mxu0  ;;  %v1142_v63 = vmax.f32 %v845_v28, 0.0 }
 0x1fb   : > { %v1025_v37 = vadd.f32 %v1024_v48, %v3490_v7  ;;  %v1143_v44 = vmax.f32 %v934_v55, 0.0 }
 0x1fc   : > { %v1145_v57 = vmax.f32 %v758_v2, 0.0 }
 0x1fd   : > { %v1148_v10 = vmax.f32 %v1025_v37, 0.0 }
 0x1fe   : > { %v3797_v29 = vpack.c.bf16 %v1145_v57, %v1141_v5 }
 0x1ff   : > { %v846_v15 = vpop.f32.mrf.mxu2  ;;  %v3800_v49 = vpack.c.bf16 %v1148_v10, %v1144_v14 }
 0x200   : > { %v847_v26 = vadd.f32 %v846_v15, %v3497_v17  ;;  %v935_v25 = vpop.f32.mrf.mxu3 }
 0x201   : > { %v936_v16 = vadd.f32 %v935_v25, %v3500_v21  ;;  %v760_v61 = vpop.f32.mrf.mxu1 }
 0x202   : > { %v1146_v19 = vmax.f32 %v847_v26, 0.0  ;;  %v1027_v35 = vpop.f32.mrf.mxu0  ;;  %v761_v50 = vadd.f32 %v760_v61, %v3488_v6 }
 0x203   : > { %v1147_v22 = vmax.f32 %v936_v16, 0.0  ;;  %v1028_v33 = vadd.f32 %v1027_v35, %v3490_v7 }
 0x204   : > { %1526 = vmatmul.bf16.gmra.mxu1 %v3661_v47  ;;  %1615 = vmatmul.bf16.gmra.mxu2 %v3668_v60  ;;  %v3806_v4 = vpack.c.bf16 %v1146_v19, %v1142_v63  ;;  %v1149_v1 = vmax.f32 %v761_v50, 0.0 }
 0x205   : > { %1704 = vmatmul.bf16.gmra.mxu3 %v3670_v9  ;;  %1793 = vmatmul.bf16.gmra.mxu0 %v3664_v40  ;;  %v3810_v8 = vpack.c.bf16 %v1147_v22, %v1143_v44  ;;  %v1152_v56 = vmax.f32 %v1028_v33, 0.0 }
 0x207   : > { %v849_v27 = vpop.f32.mrf.mxu2 }
 0x208   : > { %v938_v53 = vpop.f32.mrf.mxu3  ;;  %v850_v40 = vadd.f32 %v849_v27, %v3497_v17 }
 0x209   : > { %v762_v39 = vpop.f32.mrf.mxu1  ;;  %v939_v48 = vadd.f32 %v938_v53, %v3500_v21 }
 0x20a   : > { %v763_v46 = vadd.f32 %v762_v39, %v3488_v6  ;;  %v1029_v47 = vpop.f32.mrf.mxu0  ;;  %v1150_v55 = vmax.f32 %v850_v40, 0.0 }
 0x20b   : > { %v1030_v60 = vadd.f32 %v1029_v47, %v3490_v7  ;;  %v1151_v25 = vmax.f32 %v939_v48, 0.0 }
 0x20c   : > { %v1153_v43 = vmax.f32 %v763_v46, 0.0 }
 0x20d   : > { %v1156_v9 = vmax.f32 %v1030_v60, 0.0 }
 0x20e   : > { %v3817_v2 = vpack.c.bf16 %v1153_v43, %v1149_v1 }
 0x20f   : > { %v851_v37 = vpop.f32.mrf.mxu2  ;;  %v3820_v5 = vpack.c.bf16 %v1156_v9, %v1152_v56 }
 0x210   : > { %v852_v57 = vadd.f32 %v851_v37, %v3497_v17  ;;  %v940_v14 = vpop.f32.mrf.mxu3 }
 0x211   : > { %v941_v10 = vadd.f32 %v940_v14, %v3500_v21  ;;  %v765_v28 = vpop.f32.mrf.mxu1 }
 0x212   : > { %v1154_v15 = vmax.f32 %v852_v57, 0.0  ;;  %v1032_v26 = vpop.f32.mrf.mxu0  ;;  %v766_v35 = vadd.f32 %v765_v28, %v3488_v6 }
 0x213   : > { %v1155_v16 = vmax.f32 %v941_v10, 0.0  ;;  %v1033_v22 = vadd.f32 %v1032_v26, %v3490_v7 }
 0x214   : > { %1531 = vmatmul.bf16.gmra.mxu1 %v3677_v0  ;;  %1620 = vmatmul.bf16.gmra.mxu2 %v3686_v52  ;;  %v3826_v61 = vpack.c.bf16 %v1154_v15, %v1150_v55  ;;  %v1157_v53 = vmax.f32 %v766_v35, 0.0  ;;  %v1844_v55 = vlaneseq }
 0x215   : > { %1709 = vmatmul.bf16.gmra.mxu3 %v3690_v58  ;;  %1798 = vmatmul.bf16.gmra.mxu0 %v3680_v30  ;;  %v3830_v63 = vpack.c.bf16 %v1155_v16, %v1151_v25  ;;  %v1229_v58 = vld [vmem:[%s4508_s1 + $0x108] sm:$0x1]  ;;  %v1160_v33 = vmax.f32 %v1033_v22, 0.0 }
 0x216   : > { %v1230_v47 = vunpack.c.l.bf16 %v1229_v58  ;;  %v3858_v25 = vand.u32 127, %v1844_v55 }
 0x217   : > { %v854_v19 = vpop.f32.mrf.mxu2 }
 0x218   : > { %v943_v44 = vpop.f32.mrf.mxu3  ;;  %v855_v46 = vadd.f32 %v854_v19, %v3497_v17  ;;  %v3847_v57 = vperm.slane %v1230_v47, 0  ;;  %vm1846_vm1 = vcmp.lt.s32.totalorder %v3858_v25, 4  ;;  %vm1847_vm2 = vcmp.eq.s32.totalorder %v3858_v25, 4 }
 0x219   : > { %v767_v27 = vpop.f32.mrf.mxu1  ;;  %v944_v1 = vadd.f32 %v943_v44, %v3500_v21 }
 0x21a   : > { %v768_v50 = vadd.f32 %v767_v27, %v3488_v6  ;;  %v1034_v0 = vpop.f32.mrf.mxu0  ;;  %v1158_v48 = vmax.f32 %v855_v46, 0.0 }
 0x21b   : > { %v1035_v52 = vadd.f32 %v1034_v0, %v3490_v7  ;;  %v1159_v10 = vmax.f32 %v944_v1, 0.0 }
 0x21c   : > { %v1161_v30 = vmax.f32 %v768_v50, 0.0 }
 0x21d   : > { %v1164_v39 = vmax.f32 %v1035_v52, 0.0 }
 0x21e   : > { %v3840_v60 = vpack.c.bf16 %v1161_v30, %v1157_v53 }
 0x21f   : > { %v3843_v43 = vpack.c.bf16 %v1164_v39, %v1160_v33  ;;  %v856_v6 = vpop.f32.mrf.mxu2 }
 0x220   : > { %v857_v7 = vadd.f32 %v856_v6, %v3497_v17  ;;  %v945_v56 = vpop.f32.mrf.mxu3 }
 0x221   : > { %v946_v9 = vadd.f32 %v945_v56, %v3500_v21  ;;  %v1497_v40 = vpop.f32.mrf.mxu1 }
 0x222   : > { %v1162_v37 = vmax.f32 %v857_v7, 0.0  ;;  %v1764_v14 = vpop.f32.mrf.mxu0  ;;  %v1498_v21 = vadd.f32 %v1497_v40, %v3847_v57 }
 0x223   : > { %v1163_v28 = vmax.f32 %v946_v9, 0.0 }
 0x224   : > { %1536 = vmatmul.bf16.gmra.mxu1 %v3697_v11  ;;  %1625 = vmatmul.bf16.gmra.mxu2 %v3706_v38  ;;  %v3851_v15 = vpack.c.bf16 %v1162_v37, %v1158_v48 }
 0x225   : > { %1714 = vmatmul.bf16.gmra.mxu3 %v3710_v51  ;;  %1803 = vmatmul.bf16.gmra.mxu0 %v3700_v20  ;;  %v3855_v17 = vpack.c.bf16 %v1163_v28, %v1159_v10 }
 0x227   : > { %v1586_v26 = vpop.f32.mrf.mxu2 }
 0x228   : > { %v1587_v16 = vadd.f32 %v1586_v26, %v1498_v21  ;;  %v1675_v19 = vpop.f32.mrf.mxu3 }
 0x229   : > { %v1499_v35 = vpop.f32.mrf.mxu1 }
 0x22a   : > { %v1676_v44 = vadd.f32 %v1675_v19, %v1587_v16  ;;  %v1766_v11 = vpop.f32.mrf.mxu0  ;;  %v1500_v51 = vadd.f32 %v1499_v35, %v3847_v57 }
 0x22c   : > { %v3861_v38 = vadd.f32 %v1764_v14, %v1676_v44 }
 0x22e   : > { %v3867_v20 = vsel %vm1846_vm1, %v3861_v38, -inf }
 0x22f   : > { %v1588_v22 = vpop.f32.mrf.mxu2  ;;  %1880 = vmax.xlane.f32.xlu0 %v3867_v20 }
 0x230   : > { %v1589_v27 = vadd.f32 %v1588_v22, %v1500_v51  ;;  %v1677_v50 = vpop.f32.mrf.mxu3 }
 0x231   : > { %v1502_v0 = vpop.f32.mrf.mxu1 }
 0x232   : > { %v1678_v52 = vadd.f32 %v1677_v50, %v1589_v27  ;;  %v1769_v58 = vpop.f32.mrf.mxu0  ;;  %v1503_v30 = vadd.f32 %v1502_v0, %v3847_v57 }
 0x234   : > { %1541 = vmatmul.bf16.gmra.mxu1 %v3717_v3  ;;  %1630 = vmatmul.bf16.gmra.mxu2 %v3726_v54  ;;  %v3872_v53 = vadd.f32 %v1766_v11, %v1678_v52 }
 0x235   : > { %1719 = vmatmul.bf16.gmra.mxu3 %v3730_v24  ;;  %1808 = vmatmul.bf16.gmra.mxu0 %v3720_v31 }
 0x236   : > { %v3880_v33 = vsel %vm1846_vm1, %v3872_v53, -inf }
 0x237   : > { %v1591_v39 = vpop.f32.mrf.mxu2  ;;  %1882 = vmax.xlane.f32.xlu0 %v3880_v33 }
 0x238   : > { %v1592_v46 = vadd.f32 %v1591_v39, %v1503_v30  ;;  %v1680_v3 = vpop.f32.mrf.mxu3 }
 0x239   : > { %v1504_v47 = vpop.f32.mrf.mxu1 }
 0x23a   : > { %v1681_v54 = vadd.f32 %v1680_v3, %v1592_v46  ;;  %v1771_v1 = vpop.f32.mrf.mxu0  ;;  %v1505_v24 = vadd.f32 %v1504_v47, %v3847_v57 }
 0x23c   : > { %v3883_v6 = vadd.f32 %v1769_v58, %v1681_v54 }
 0x23e   : > { %v3889_v31 = vsel %vm1846_vm1, %v3883_v6, -inf }
 0x23f   : > { %v1593_v7 = vpop.f32.mrf.mxu2  ;;  %1884 = vmax.xlane.f32.xlu1 %v3889_v31 }
 0x240   : > { %v1594_v56 = vadd.f32 %v1593_v7, %v1505_v24  ;;  %v1682_v9 = vpop.f32.mrf.mxu3 }
 0x241   : > { %v1507_v40 = vpop.f32.mrf.mxu1 }
 0x242   : > { %v1683_v48 = vadd.f32 %v1682_v9, %v1594_v56  ;;  %v1774_v37 = vpop.f32.mrf.mxu0  ;;  %v1508_v10 = vadd.f32 %v1507_v40, %v3847_v57 }
 0x244   : > { %1546 = vmatmul.bf16.gmra.mxu1 %v3737_v41  ;;  %1635 = vmatmul.bf16.gmra.mxu2 %v3746_v36  ;;  %v3894_v14 = vadd.f32 %v1771_v1, %v1683_v48 }
 0x245   : > { %1724 = vmatmul.bf16.gmra.mxu3 %v3750_v13  ;;  %1813 = vmatmul.bf16.gmra.mxu0 %v3740_v62 }
 0x246   : > { %v3902_v28 = vsel %vm1846_vm1, %v3894_v14, -inf }
 0x247   : > { %v1596_v55 = vpop.f32.mrf.mxu2  ;;  %1886 = vmax.xlane.f32.xlu1 %v3902_v28 }
 0x248   : > { %v1597_v21 = vadd.f32 %v1596_v55, %v1508_v10  ;;  %v1685_v41 = vpop.f32.mrf.mxu3 }
 0x249   : > { %v1509_v26 = vpop.f32.mrf.mxu1 }
 0x24a   : > { %v1686_v36 = vadd.f32 %v1685_v41, %v1597_v21  ;;  %v1776_v16 = vpop.f32.mrf.mxu0  ;;  %v1510_v13 = vadd.f32 %v1509_v26, %v3847_v57 }
 0x24c   : > { %v3905_v19 = vadd.f32 %v1774_v37, %v1686_v36 }
 0x24e   : > { %v3911_v62 = vsel %vm1846_vm1, %v3905_v19, -inf }
 0x24f   : > { %v1598_v35 = vpop.f32.mrf.mxu2  ;;  %1888 = vmax.xlane.f32.xlu2 %v3911_v62 }
 0x250   : > { %v1599_v44 = vadd.f32 %v1598_v35, %v1510_v13  ;;  %v1687_v11 = vpop.f32.mrf.mxu3 }
 0x251   : > { %v1512_v51 = vpop.f32.mrf.mxu1 }
 0x252   : > { %v1688_v22 = vadd.f32 %v1687_v11, %v1599_v44  ;;  %v1779_v27 = vpop.f32.mrf.mxu0  ;;  %v1513_v0 = vadd.f32 %v1512_v51, %v3847_v57 }
 0x254   : > { %1551 = vmatmul.bf16.gmra.mxu1 %v3757_v45  ;;  %1640 = vmatmul.bf16.gmra.mxu2 %v3766_v23  ;;  %v3916_v50 = vadd.f32 %v1776_v16, %v1688_v22 }
 0x255   : > { %1729 = vmatmul.bf16.gmra.mxu3 %v3770_v34  ;;  %1818 = vmatmul.bf16.gmra.mxu0 %v3760_v59 }
 0x256   : > { %v3924_v52 = vsel %vm1846_vm1, %v3916_v50, -inf }
 0x257   : > { %v1601_v58 = vpop.f32.mrf.mxu2  ;;  %1890 = vmax.xlane.f32.xlu2 %v3924_v52 }
 0x258   : > { %v1602_v30 = vadd.f32 %v1601_v58, %v1513_v0  ;;  %v1690_v45 = vpop.f32.mrf.mxu3 }
 0x259   : > { %v1514_v39 = vpop.f32.mrf.mxu1 }
 0x25a   : > { %v1691_v23 = vadd.f32 %v1690_v45, %v1602_v30  ;;  %v1781_v46 = vpop.f32.mrf.mxu0  ;;  %v1515_v34 = vadd.f32 %v1514_v39, %v3847_v57 }
 0x25c   : > { %v3927_v3 = vadd.f32 %v1779_v27, %v1691_v23 }
 0x25e   : > { %v3933_v59 = vsel %vm1846_vm1, %v3927_v3, -inf }
 0x25f   : > { %v1603_v47 = vpop.f32.mrf.mxu2  ;;  %1892 = vmax.xlane.f32.xlu0 %v3933_v59 }
 0x260   : > { %v1604_v54 = vadd.f32 %v1603_v47, %v1515_v34  ;;  %v1692_v1 = vpop.f32.mrf.mxu3 }
 0x261   : > { %v1517_v24 = vpop.f32.mrf.mxu1 }
 0x262   : > { %v1693_v7 = vadd.f32 %v1692_v1, %v1604_v54  ;;  %v1784_v56 = vpop.f32.mrf.mxu0  ;;  %v1518_v40 = vadd.f32 %v1517_v24, %v3847_v57 }
 0x264   : > { %1556 = vmatmul.bf16.gmra.mxu1 %v3777_v32  ;;  %1645 = vmatmul.bf16.gmra.mxu2 %v3786_v12  ;;  %v3938_v9 = vadd.f32 %v1781_v46, %v1693_v7 }
 0x265   : > { %1734 = vmatmul.bf16.gmra.mxu3 %v3790_v18  ;;  %1823 = vmatmul.bf16.gmra.mxu0 %v3780_v42 }
 0x266   : > { %v3946_v48 = vsel %vm1846_vm1, %v3938_v9, -inf }
 0x267   : > { %v1606_v37 = vpop.f32.mrf.mxu2  ;;  %1894 = vmax.xlane.f32.xlu1 %v3946_v48 }
 0x268   : > { %v1607_v10 = vadd.f32 %v1606_v37, %v1518_v40  ;;  %v1695_v32 = vpop.f32.mrf.mxu3 }
 0x269   : > { %v1519_v55 = vpop.f32.mrf.mxu1 }
 0x26a   : > { %v1696_v12 = vadd.f32 %v1695_v32, %v1607_v10  ;;  %v1786_v21 = vpop.f32.mrf.mxu0  ;;  %v1520_v18 = vadd.f32 %v1519_v55, %v3847_v57 }
 0x26c   : > { %v3949_v41 = vadd.f32 %v1784_v56, %v1696_v12 }
 0x26e   : > { %v3955_v42 = vsel %vm1846_vm1, %v3949_v41, -inf }
 0x26f   : > { %v1608_v26 = vpop.f32.mrf.mxu2  ;;  %1896 = vmax.xlane.f32.xlu2 %v3955_v42 }
 0x270   : > { %v1609_v36 = vadd.f32 %v1608_v26, %v1520_v18  ;;  %v1697_v16 = vpop.f32.mrf.mxu3 }
 0x271   : > { %v1522_v13 = vpop.f32.mrf.mxu1 }
 0x272   : > { %v1698_v35 = vadd.f32 %v1697_v16, %v1609_v36  ;;  %v1789_v44 = vpop.f32.mrf.mxu0  ;;  %v1523_v51 = vadd.f32 %v1522_v13, %v3847_v57 }
 0x274   : > { %1561 = vmatmul.bf16.gmra.mxu1 %v3797_v29  ;;  %1650 = vmatmul.bf16.gmra.mxu2 %v3806_v4  ;;  %v3960_v11 = vadd.f32 %v1786_v21, %v1698_v35 }
 0x275   : > { %1739 = vmatmul.bf16.gmra.mxu3 %v3810_v8  ;;  %1828 = vmatmul.bf16.gmra.mxu0 %v3800_v49 }
 0x276   : > { %v3968_v22 = vsel %vm1846_vm1, %v3960_v11, -inf }
 0x277   : > { %v1611_v27 = vpop.f32.mrf.mxu2  ;;  %1898 = vmax.xlane.f32.xlu0 %v3968_v22 }
 0x278   : > { %v1612_v0 = vadd.f32 %v1611_v27, %v1523_v51  ;;  %v1700_v29 = vpop.f32.mrf.mxu3 }
 0x279   : > { %v1524_v58 = vpop.f32.mrf.mxu1 }
 0x27a   : > { %v1701_v4 = vadd.f32 %v1700_v29, %v1612_v0  ;;  %v1791_v30 = vpop.f32.mrf.mxu0  ;;  %v1525_v8 = vadd.f32 %v1524_v58, %v3847_v57 }
 0x27c   : > { %v3971_v45 = vadd.f32 %v1789_v44, %v1701_v4 }
 0x27e   : > { %v3977_v49 = vsel %vm1846_vm1, %v3971_v45, -inf }
 0x27f   : > { %v1613_v39 = vpop.f32.mrf.mxu2  ;;  %1900 = vmax.xlane.f32.xlu1 %v3977_v49 }
 0x280   : > { %v1614_v23 = vadd.f32 %v1613_v39, %v1525_v8  ;;  %v1702_v46 = vpop.f32.mrf.mxu3 }
 0x281   : > { %v1527_v34 = vpop.f32.mrf.mxu1 }
 0x282   : > { %v1703_v47 = vadd.f32 %v1702_v46, %v1614_v23  ;;  %v1794_v54 = vpop.f32.mrf.mxu0  ;;  %v1528_v24 = vadd.f32 %v1527_v34, %v3847_v57 }
 0x284   : > { %1566 = vmatmul.bf16.gmra.mxu1 %v3817_v2  ;;  %1655 = vmatmul.bf16.gmra.mxu2 %v3826_v61  ;;  %v3982_v1 = vadd.f32 %v1791_v30, %v1703_v47 }
 0x285   : > { %1744 = vmatmul.bf16.gmra.mxu3 %v3830_v63  ;;  %1833 = vmatmul.bf16.gmra.mxu0 %v3820_v5 }
 0x286   : > { %4530 = vst [vmem:[#allocation5_spill] sm:$0xff] %v3982_v1  ;;  %v3990_v7 = vsel %vm1846_vm1, %v3982_v1, -inf }
 0x287   : > { %v1616_v56 = vpop.f32.mrf.mxu2  ;;  %1902 = vmax.xlane.f32.xlu2 %v3990_v7 }
 0x288   : > { %v1617_v40 = vadd.f32 %v1616_v56, %v1528_v24  ;;  %v1705_v2 = vpop.f32.mrf.mxu3 }
 0x289   : > { %v1529_v37 = vpop.f32.mrf.mxu1 }
 0x28a   : > { %v1706_v61 = vadd.f32 %v1705_v2, %v1617_v40  ;;  %v1796_v10 = vpop.f32.mrf.mxu0  ;;  %v1530_v63 = vadd.f32 %v1529_v37, %v3847_v57 }
 0x28c   : > { %v3993_v32 = vadd.f32 %v1794_v54, %v1706_v61 }
 0x28e   : > { %v3999_v5 = vsel %vm1846_vm1, %v3993_v32, -inf }
 0x28f   : > { %v1618_v55 = vpop.f32.mrf.mxu2  ;;  %1904 = vmax.xlane.f32.xlu0 %v3999_v5 }
 0x290   : > { %v1619_v12 = vadd.f32 %v1618_v55, %v1530_v63  ;;  %v1707_v21 = vpop.f32.mrf.mxu3 }
 0x291   : > { %v1532_v18 = vpop.f32.mrf.mxu1 }
 0x292   : > { %v1708_v26 = vadd.f32 %v1707_v21, %v1619_v12  ;;  %v1799_v36 = vpop.f32.mrf.mxu0  ;;  %v1533_v13 = vadd.f32 %v1532_v18, %v3847_v57 }
 0x294   : > { %1571 = vmatmul.bf16.gmra.mxu1 %v3840_v60  ;;  %1660 = vmatmul.bf16.gmra.mxu2 %v3851_v15  ;;  %v4004_v16 = vadd.f32 %v1796_v10, %v1708_v26 }
 0x295   : > { %1749 = vmatmul.bf16.gmra.mxu3 %v3855_v17 }
 0x296   : > { %4531 = vst [vmem:[#allocation6_spill] sm:$0xff] %v4004_v16  ;;  %v4011_v35 = vsel %vm1846_vm1, %v4004_v16, -inf }
 0x297   : > { %v1621_v44 = vpop.f32.mrf.mxu2  ;;  %1906 = vmax.xlane.f32.xlu1 %v4011_v35 }
 0x298   : > { %v1622_v51 = vadd.f32 %v1621_v44, %v1533_v13  ;;  %v1710_v27 = vpop.f32.mrf.mxu3 }
 0x299   : > { %v1534_v0 = vpop.f32.mrf.mxu1 }
 0x29a   : > { %v1711_v60 = vadd.f32 %v1710_v27, %v1622_v51  ;;  %v1801_v29 = vpop.f32.mrf.mxu0  ;;  %v1535_v58 = vadd.f32 %v1534_v0, %v3847_v57 }
 0x29c   : > { %v4014_v15 = vadd.f32 %v1799_v36, %v1711_v60 }
 0x29e   : > { %4532 = vst [vmem:[#allocation7_spill] sm:$0xff] %v4014_v15  ;;  %v4020_v17 = vsel %vm1846_vm1, %v4014_v15, -inf }
 0x29f   : > { %v1623_v4 = vpop.f32.mrf.mxu2  ;;  %1908 = vmax.xlane.f32.xlu2 %v4020_v17 }
 0x2a0   : > { %v1624_v30 = vadd.f32 %v1623_v4, %v1535_v58  ;;  %v1712_v8 = vpop.f32.mrf.mxu3 }
 0x2a1   : > { %v1537_v39 = vpop.f32.mrf.mxu1 }
 0x2a2   : > { %v1713_v23 = vadd.f32 %v1712_v8, %v1624_v30  ;;  %v1804_v46 = vpop.f32.mrf.mxu0  ;;  %v1881_v34 = vpop.xlane.xlu0 %1880  ;;  %v1538_v56 = vadd.f32 %v1537_v39, %v3847_v57 }
 0x2a3   : > { %v1944_v47 = vsub.f32 %v3867_v20, %v1881_v34 }
 0x2a4   : > { %1838 = vmatmul.bf16.vlgmr.msrb.gmra.mxu2 %v3843_v43  ;;  %v4025_v54 = vadd.f32 %v1801_v29, %v1713_v23 }
 0x2a5   : > { %v1976_v24 = vmul.f32 1.442695, %v1944_v47 }
 0x2a6   : > { %v4031_v40 = vsel %vm1846_vm1, %v4025_v54, -inf }
 0x2a7   : > { %2892 = vpow2.f32 %v1976_v24  ;;  %v1626_v2 = vpop.f32.mrf.mxu2  ;;  %1910 = vmax.xlane.f32.xlu0 %v4031_v40 }
 0x2a8   : > { %v1627_v37 = vadd.f32 %v1626_v2, %v1538_v56  ;;  %v1715_v61 = vpop.f32.mrf.mxu3 }
 0x2a9   : > { %v1539_v10 = vpop.f32.mrf.mxu1 }
 0x2aa   : > { %v1716_v20 = vadd.f32 %v1715_v61, %v1627_v37  ;;  %v1806_v63 = vpop.f32.mrf.mxu0  ;;  %v1883_v43 = vpop.xlane.xlu0 %1882  ;;  %v1540_v26 = vadd.f32 %v1539_v10, %v3847_v57 }
 0x2ab   : > { %v1945_v55 = vsub.f32 %v3880_v33, %v1883_v43 }
 0x2ac   : > { %v4035_v12 = vadd.f32 %v1804_v46, %v1716_v20 }
 0x2ad   : > { %v4037_v21 = vpop.eup %2892  ;;  %v1978_v18 = vmul.f32 1.442695, %v1945_v55 }
 0x2ae   : > { %4533 = vst [vmem:[#allocation8_spill] sm:$0xff] %v4035_v12  ;;  %2040 = vadd.xlane.f32.xlu2 %v4037_v21  ;;  %v4044_v36 = vsel %vm1846_vm1, %v4035_v12, -inf }
 0x2af   : > { %2894 = vpow2.f32 %v1978_v18  ;;  %v1628_v13 = vpop.f32.mrf.mxu2  ;;  %1912 = vmax.xlane.f32.xlu1 %v4044_v36 }
 0x2b0   : > { %v1629_v44 = vadd.f32 %v1628_v13, %v1540_v26  ;;  %v1717_v33 = vpop.f32.mrf.mxu3 }
 0x2b1   : > { %v1542_v51 = vpop.f32.mrf.mxu1 }
 0x2b2   : > { %v1718_v27 = vadd.f32 %v1717_v33, %v1629_v44  ;;  %v1809_v0 = vpop.f32.mrf.mxu0  ;;  %v1885_v60 = vpop.xlane.xlu1 %1884  ;;  %v1543_v8 = vadd.f32 %v1542_v51, %v3847_v57 }
 0x2b3   : > { %v1946_v29 = vsub.f32 %v3889_v31, %v1885_v60 }
 0x2b4   : > { %v4048_v58 = vadd.f32 %v1806_v63, %v1718_v27 }
 0x2b5   : > { %v4050_v4 = vpop.eup %2894  ;;  %v1980_v30 = vmul.f32 1.442695, %v1946_v29 }
 0x2b6   : > { %4534 = vst [vmem:[#allocation9_spill] sm:$0xff] %v4048_v58  ;;  %2042 = vadd.xlane.f32.xlu0 %v4050_v4  ;;  %v4057_v39 = vsel %vm1846_vm1, %v4048_v58, -inf }
 0x2b7   : > { %2896 = vpow2.f32 %v1980_v30  ;;  %v1631_v23 = vpop.f32.mrf.mxu2  ;;  %1914 = vmax.xlane.f32.xlu2 %v4057_v39 }
 0x2b8   : > { %v1632_v46 = vadd.f32 %v1631_v23, %v1543_v8  ;;  %v1720_v31 = vpop.f32.mrf.mxu3 }
 0x2b9   : > { %v1544_v34 = vpop.f32.mrf.mxu1 }
 0x2ba   : > { %v1721_v47 = vadd.f32 %v1720_v31, %v1632_v46  ;;  %v1811_v24 = vpop.f32.mrf.mxu0  ;;  %v1887_v56 = vpop.xlane.xlu1 %1886  ;;  %v1545_v20 = vadd.f32 %v1544_v34, %v3847_v57 }
 0x2bb   : > { %v1947_v2 = vsub.f32 %v3902_v28, %v1887_v56 }
 0x2bc   : > { %v4061_v37 = vadd.f32 %v1809_v0, %v1721_v47 }
 0x2bd   : > { %v4063_v61 = vpop.eup %2896  ;;  %v1982_v10 = vmul.f32 1.442695, %v1947_v2 }
 0x2be   : > { %4535 = vst [vmem:[#allocation10_spill] sm:$0xff] %v4061_v37  ;;  %2044 = vadd.xlane.f32.xlu1 %v4063_v61  ;;  %v4070_v63 = vsel %vm1846_vm1, %v4061_v37, -inf }
 0x2bf   : > { %2898 = vpow2.f32 %v1982_v10  ;;  %v1633_v43 = vpop.f32.mrf.mxu2  ;;  %1916 = vmax.xlane.f32.xlu0 %v4070_v63 }
 0x2c0   : > { %v1634_v55 = vadd.f32 %v1633_v43, %v1545_v20  ;;  %v1722_v28 = vpop.f32.mrf.mxu3 }
 0x2c1   : > { %v1547_v18 = vpop.f32.mrf.mxu1 }
 0x2c2   : > { %v1723_v26 = vadd.f32 %v1722_v28, %v1634_v55  ;;  %v1814_v13 = vpop.f32.mrf.mxu0  ;;  %v1889_v44 = vpop.xlane.xlu2 %1888  ;;  %v1548_v60 = vadd.f32 %v1547_v18, %v3847_v57 }
 0x2c3   : > { %v1948_v33 = vsub.f32 %v3911_v62, %v1889_v44 }
 0x2c4   : > { %v4074_v51 = vadd.f32 %v1811_v24, %v1723_v26 }
 0x2c5   : > { %v4076_v27 = vpop.eup %2898  ;;  %v1984_v0 = vmul.f32 1.442695, %v1948_v33 }
 0x2c6   : > { %4536 = vst [vmem:[#allocation11_spill] sm:$0xff] %v4074_v51  ;;  %2046 = vadd.xlane.f32.xlu2 %v4076_v27  ;;  %v4083_v29 = vsel %vm1846_vm1, %v4074_v51, -inf }
 0x2c7   : > { %2900 = vpow2.f32 %v1984_v0  ;;  %v1636_v30 = vpop.f32.mrf.mxu2  ;;  %1918 = vmax.xlane.f32.xlu1 %v4083_v29 }
 0x2c8   : > { %v1637_v8 = vadd.f32 %v1636_v30, %v1548_v60  ;;  %v1725_v62 = vpop.f32.mrf.mxu3 }
 0x2c9   : > { %v1549_v23 = vpop.f32.mrf.mxu1 }
 0x2ca   : > { %v1726_v46 = vadd.f32 %v1725_v62, %v1637_v8  ;;  %v1816_v31 = vpop.f32.mrf.mxu0  ;;  %v1891_v34 = vpop.xlane.xlu2 %1890  ;;  %v1550_v10 = vadd.f32 %v1549_v23, %v3847_v57 }
 0x2cb   : > { %v1949_v47 = vsub.f32 %v3924_v52, %v1891_v34 }
 0x2cc   : > { %v4087_v24 = vadd.f32 %v1814_v13, %v1726_v46 }
 0x2cd   : > { %v4089_v56 = vpop.eup %2900  ;;  %v1986_v2 = vmul.f32 1.442695, %v1949_v47 }
 0x2ce   : > { %4537 = vst [vmem:[#allocation12_spill] sm:$0xff] %v4087_v24  ;;  %2048 = vadd.xlane.f32.xlu0 %v4089_v56  ;;  %v4096_v20 = vsel %vm1846_vm1, %v4087_v24, -inf }
 0x2cf   : > { %2902 = vpow2.f32 %v1986_v2  ;;  %v1638_v43 = vpop.f32.mrf.mxu2  ;;  %1920 = vmax.xlane.f32.xlu2 %v4096_v20 }
 0x2d0   : > { %v1639_v55 = vadd.f32 %v1638_v43, %v1550_v10  ;;  %v1727_v52 = vpop.f32.mrf.mxu3 }
 0x2d1   : > { %v1552_v28 = vpop.f32.mrf.mxu1 }
 0x2d2   : > { %v1728_v18 = vadd.f32 %v1727_v52, %v1639_v55  ;;  %v1819_v26 = vpop.f32.mrf.mxu0  ;;  %v1893_v13 = vpop.xlane.xlu0 %1892  ;;  %v1553_v30 = vadd.f32 %v1552_v28, %v3847_v57 }
 0x2d3   : > { %v1950_v44 = vsub.f32 %v3933_v59, %v1893_v13 }
 0x2d4   : > { %v4100_v33 = vadd.f32 %v1816_v31, %v1728_v18 }
 0x2d5   : > { %v4102_v0 = vpop.eup %2902  ;;  %v1988_v60 = vmul.f32 1.442695, %v1950_v44 }
 0x2d6   : > { %4538 = vst [vmem:[#allocation13_spill] sm:$0xff] %v4100_v33  ;;  %2050 = vadd.xlane.f32.xlu1 %v4102_v0  ;;  %v4109_v8 = vsel %vm1846_vm1, %v4100_v33, -inf }
 0x2d7   : > { %2904 = vpow2.f32 %v1988_v60  ;;  %v1641_v62 = vpop.f32.mrf.mxu2  ;;  %1922 = vmax.xlane.f32.xlu0 %v4109_v8 }
 0x2d8   : > { %v1642_v23 = vadd.f32 %v1641_v62, %v1553_v30  ;;  %v1730_v59 = vpop.f32.mrf.mxu3 }
 0x2d9   : > { %v1554_v46 = vpop.f32.mrf.mxu1 }
 0x2da   : > { %v1731_v31 = vadd.f32 %v1730_v59, %v1642_v23  ;;  %v1821_v34 = vpop.f32.mrf.mxu0  ;;  %v1895_v47 = vpop.xlane.xlu1 %1894  ;;  %v1555_v52 = vadd.f32 %v1554_v46, %v3847_v57 }
 0x2db   : > { %v1951_v2 = vsub.f32 %v3946_v48, %v1895_v47 }
 0x2dc   : > { %v4113_v10 = vadd.f32 %v1819_v26, %v1731_v31 }
 0x2dd   : > { %v4115_v43 = vpop.eup %2904  ;;  %v1990_v55 = vmul.f32 1.442695, %v1951_v2 }
 0x2de   : > { %4539 = vst [vmem:[#allocation14_spill] sm:$0xff] %v4113_v10  ;;  %2052 = vadd.xlane.f32.xlu2 %v4115_v43  ;;  %v4122_v28 = vsel %vm1846_vm1, %v4113_v10, -inf }
 0x2df   : > { %2906 = vpow2.f32 %v1990_v55  ;;  %v1643_v18 = vpop.f32.mrf.mxu2  ;;  %1924 = vmax.xlane.f32.xlu1 %v4122_v28 }
 0x2e0   : > { %v1644_v13 = vadd.f32 %v1643_v18, %v1555_v52  ;;  %v1732_v48 = vpop.f32.mrf.mxu3 }
 0x2e1   : > { %v1557_v26 = vpop.f32.mrf.mxu1 }
 0x2e2   : > { %v1733_v44 = vadd.f32 %v1732_v48, %v1644_v13  ;;  %v1824_v60 = vpop.f32.mrf.mxu0  ;;  %v1897_v30 = vpop.xlane.xlu2 %1896  ;;  %v1558_v31 = vadd.f32 %v1557_v26, %v3847_v57 }
 0x2e3   : > { %v1952_v62 = vsub.f32 %v3955_v42, %v1897_v30 }
 0x2e4   : > { %v4126_v23 = vadd.f32 %v1821_v34, %v1733_v44 }
 0x2e5   : > { %v4128_v59 = vpop.eup %2906  ;;  %v1992_v46 = vmul.f32 1.442695, %v1952_v62 }
 0x2e6   : > { %4540 = vst [vmem:[#allocation15_spill] sm:$0xff] %v4126_v23  ;;  %2054 = vadd.xlane.f32.xlu0 %v4128_v59  ;;  %v4135_v47 = vsel %vm1846_vm1, %v4126_v23, -inf }
 0x2e7   : > { %2908 = vpow2.f32 %v1992_v46  ;;  %v1646_v2 = vpop.f32.mrf.mxu2  ;;  %1926 = vmax.xlane.f32.xlu2 %v4135_v47 }
 0x2e8   : > { %v1647_v55 = vadd.f32 %v1646_v2, %v1558_v31  ;;  %v1735_v42 = vpop.f32.mrf.mxu3 }
 0x2e9   : > { %v1559_v34 = vpop.f32.mrf.mxu1 }
 0x2ea   : > { %v1736_v52 = vadd.f32 %v1735_v42, %v1647_v55  ;;  %v1899_v18 = vpop.xlane.xlu0 %1898  ;;  %v1826_v13 = vpop.f32.mrf.mxu0  ;;  %v1560_v62 = vadd.f32 %v1559_v34, %v3847_v57 }
 0x2eb   : > { %v1953_v48 = vsub.f32 %v3968_v22, %v1899_v18 }
 0x2ec   : > { %v4139_v26 = vadd.f32 %v1824_v60, %v1736_v52 }
 0x2ed   : > { %v4141_v44 = vpop.eup %2908  ;;  %v1994_v30 = vmul.f32 1.442695, %v1953_v48 }
 0x2ee   : > { %4541 = vst [vmem:[#allocation16_spill] sm:$0xff] %v4139_v26  ;;  %2056 = vadd.xlane.f32.xlu1 %v4141_v44  ;;  %v4148_v46 = vsel %vm1846_vm1, %v4139_v26, -inf }
 0x2ef   : > { %2910 = vpow2.f32 %v1994_v30  ;;  %v1648_v31 = vpop.f32.mrf.mxu2  ;;  %1928 = vmax.xlane.f32.xlu0 %v4148_v46 }
 0x2f0   : > { %v1649_v2 = vadd.f32 %v1648_v31, %v1560_v62  ;;  %v1737_v22 = vpop.f32.mrf.mxu3 }
 0x2f1   : > { %v1562_v60 = vpop.f32.mrf.mxu1 }
 0x2f2   : > { %v1738_v55 = vadd.f32 %v1737_v22, %v1649_v2  ;;  %v1901_v42 = vpop.xlane.xlu1 %1900  ;;  %v1829_v48 = vpop.f32.mrf.mxu0  ;;  %v1563_v26 = vadd.f32 %v1562_v60, %v3847_v57 }
 0x2f3   : > { %v1954_v52 = vsub.f32 %v3977_v49, %v1901_v42 }
 0x2f4   : > { %v4152_v18 = vadd.f32 %v1826_v13, %v1738_v55 }
 0x2f5   : > { %v4154_v34 = vpop.eup %2910  ;;  %v1996_v23 = vmul.f32 1.442695, %v1954_v52 }
 0x2f6   : > { %4542 = vst [vmem:[#allocation17_spill] sm:$0xff] %v4152_v18  ;;  %2058 = vadd.xlane.f32.xlu2 %v4154_v34  ;;  %v4161_v30 = vsel %vm1846_vm1, %v4152_v18, -inf }
 0x2f7   : > { %2912 = vpow2.f32 %v1996_v23  ;;  %v1651_v62 = vpop.f32.mrf.mxu2  ;;  %1930 = vmax.xlane.f32.xlu1 %v4161_v30 }
 0x2f8   : > { %v1652_v49 = vadd.f32 %v1651_v62, %v1563_v26  ;;  %v1740_v13 = vpop.f32.mrf.mxu3 }
 0x2f9   : > { %v1564_v31 = vpop.f32.mrf.mxu1 }
 0x2fa   : > { %v1741_v2 = vadd.f32 %v1740_v13, %v1652_v49  ;;  %v1565_v60 = vadd.f32 %v1564_v31, %v3847_v57  ;;  %v1831_v23 = vpop.f32.mrf.mxu0 }
 0x2fc   : > { %v4164_v22 = vadd.f32 %v1829_v48, %v1741_v2 }
 0x2fd   : > { %v4166_v55 = vpop.eup %2912 }
 0x2fe   : > { %4543 = vst [vmem:[#allocation18_spill] sm:$0xff] %v4164_v22  ;;  %2060 = vadd.xlane.f32.xlu0 %v4166_v55  ;;  %v4173_v42 = vsel %vm1846_vm1, %v4164_v22, -inf }
 0x2ff   : > { %v1653_v52 = vpop.f32.mrf.mxu2  ;;  %1932 = vmax.xlane.f32.xlu2 %v4173_v42 }
 0x300   : > { %v1654_v26 = vadd.f32 %v1653_v52, %v1565_v60  ;;  %v1742_v62 = vpop.f32.mrf.mxu3 }
 0x301   : > { %v1567_v49 = vpop.f32.mrf.mxu1 }
 0x302   : > { %v1743_v48 = vadd.f32 %v1742_v62, %v1654_v26  ;;  %v1568_v2 = vadd.f32 %v1567_v49, %v3847_v57  ;;  %v1834_v33 = vpop.f32.mrf.mxu0  ;;  %v1905_v26 = vpop.xlane.xlu0 %1904 }
 0x304   : > { %v4176_v13 = vadd.f32 %v1831_v23, %v1743_v48  ;;  %v1956_v48 = vsub.f32 %v3999_v5, %v1905_v26 }
 0x306   : > { %4544 = vst [vmem:[#allocation19_spill] sm:$0xff] %v4176_v13  ;;  %v4182_v31 = vsel %vm1846_vm1, %v4176_v13, -inf }
 0x307   : > { %v1656_v18 = vpop.f32.mrf.mxu2  ;;  %1934 = vmax.xlane.f32.xlu0 %v4182_v31 }
 0x308   : > { %v1657_v22 = vadd.f32 %v1656_v18, %v1568_v2  ;;  %v1745_v10 = vpop.f32.mrf.mxu3  ;;  %v1903_v2 = vpop.xlane.xlu2 %1902 }
 0x309   : > { %v1569_v60 = vpop.f32.mrf.mxu1 }
 0x30a   : > { %v1746_v24 = vadd.f32 %v1745_v10, %v1657_v22  ;;  %v1570_v23 = vadd.f32 %v1569_v60, %v3847_v57  ;;  %v1836_v22 = vpop.f32.mrf.mxu0 }
 0x30c   : > { %v4185_v52 = vadd.f32 %v1834_v33, %v1746_v24  ;;  %v2000_v24 = vmul.f32 1.442695, %v1956_v48 }
 0x30e   : > { %4545 = vst [vmem:[#allocation20_spill] sm:$0xff] %v4185_v52  ;;  %v4191_v62 = vsel %vm1846_vm1, %v4185_v52, -inf  ;;  %2914 = vpow2.f32 %v2000_v24 }
 0x30f   : > { %v1658_v49 = vpop.f32.mrf.mxu2  ;;  %1936 = vmax.xlane.f32.xlu1 %v4191_v62 }
 0x310   : > { %v1659_v18 = vadd.f32 %v1658_v49, %v1570_v23  ;;  %v1747_v13 = vpop.f32.mrf.mxu3 }
 0x311   : > { %v1572_v26 = vpop.f32.mrf.mxu1 }
 0x312   : > { %v1748_v10 = vadd.f32 %v1747_v13, %v1659_v18  ;;  %v4203_v58 = vpop.xlane.xlu2 %1908  ;;  %v1573_v18 = vadd.f32 %v1572_v26, %v3847_v57 }
 0x314   : > { %v4195_v33 = vadd.f32 %v1836_v22, %v1748_v10  ;;  %v4206_v49 = vpop.eup %2914  ;;  %v1907_v10 = vpop.xlane.xlu1 %1906 }
 0x315   : > { %v1957_v51 = vsub.f32 %v4011_v35, %v1907_v10 }
 0x316   : > { %4546 = vst [vmem:[#allocation21_spill] sm:$0xff] %v4195_v33  ;;  %v4200_v60 = vsel %vm1846_vm1, %v4195_v33, -inf }
 0x317   : > { %v1661_v52 = vpop.f32.mrf.mxu2  ;;  %1938 = vmax.xlane.f32.xlu2 %v4200_v60  ;;  %v2002_v37 = vmul.f32 1.442695, %v1957_v51 }
 0x318   : > { %v1662_v33 = vadd.f32 %v1661_v52, %v1573_v18  ;;  %v1750_v24 = vpop.f32.mrf.mxu3 }
 0x31a   : > { %v1911_v5 = vpop.xlane.xlu0 %1910 }
 0x31b   : > { %v1959_v23 = vsub.f32 %v4031_v40, %v1911_v5  ;;  %v1574_v40 = vpop.f32.mrf.mxu1  ;;  %v1751_v5 = vadd.f32 %v1750_v24, %v1662_v33  ;;  %v1955_v33 = vsub.f32 %v3990_v7, %v1903_v2 }
 0x31c   : > { %v1575_v26 = vadd.f32 %v1574_v40, %v3847_v57 }
 0x31d   : > { %v2006_v13 = vmul.f32 1.442695, %v1959_v23  ;;  %v1998_v24 = vmul.f32 1.442695, %v1955_v33 }
 0x31f   : > { %2916 = vpow2.f32 %v2006_v13  ;;  %v1663_v48 = vpop.f32.mrf.mxu2  ;;  %2064 = vadd.xlane.f32.xlu2 %v4206_v49 }
 0x320   : > { %v1664_v16 = vadd.f32 %v1663_v48, %v1575_v26  ;;  %v1752_v51 = vpop.f32.mrf.mxu3 }
 0x321   : > { %v2041_v22 = vpop.xlane.xlu2 %2040 }
 0x322   : > { %2918 = vrcp.f32 %v2041_v22  ;;  %v1913_v18 = vpop.xlane.xlu1 %1912  ;;  %v1753_v48 = vadd.f32 %v1752_v51, %v1664_v16 }
 0x323   : > { %v1960_v57 = vsub.f32 %v4044_v36, %v1913_v18 }
 0x325   : > { %v4211_v15 = vpop.eup %2916  ;;  %v2008_v26 = vmul.f32 1.442695, %v1960_v57 }
 0x327   : > { %v1839_v23 = vpop.f32.mrf.mxu2  ;;  %2070 = vadd.xlane.f32.xlu2 %v4211_v15 }
 0x328   : > { %v2919_v13 = vpop.eup %2918  ;;  %v4215_v1 = vadd.f32 %v1839_v23, %v1751_v5 }
 0x329   : > { %v2136_v52 = vmul.f32 %v2919_v13, %v2041_v22  ;;  %v2043_v12 = vpop.xlane.xlu0 %2042 }
 0x32a   : > { %2920 = vrcp.f32 %v2043_v12  ;;  %v4221_v35 = vsel %vm1846_vm1, %v4215_v1, -inf }
 0x32b   : > { %v2168_v10 = vsub.f32 2.0, %v2136_v52  ;;  %1940 = vmax.xlane.f32.xlu0 %v4221_v35  ;;  %2922 = vpow2.f32 %v2002_v37  ;;  %v1915_v52 = vpop.xlane.xlu2 %1914 }
 0x32d   : > { %v2200_v22 = vmul.f32 %v2919_v13, %v2168_v10 }
 0x32f   : > { %v2232_v40 = vmul.f32 %v4037_v21, %v2200_v22  ;;  %v1841_v5 = vpop.f32.mrf.mxu2 }
 0x330   : > { %v2921_v23 = vpop.eup %2920  ;;  %v4230_v7 = vadd.f32 %v1841_v5, %v1753_v48 }
 0x331   : > { %v2264_v37 = vsel %vm1847_vm2, %v3861_v38, %v2232_v40  ;;  %v2137_v2 = vmul.f32 %v2921_v23, %v2043_v12  ;;  %v2045_v36 = vpop.xlane.xlu1 %2044  ;;  %v4235_v18 = vpop.eup %2922  ;;  %v1958_v12 = vsub.f32 %v4020_v17, %v4203_v58 }
 0x332   : > { %2296 = vst [vmem:[%s4237_s30] sm:$0xff] %v2264_v37  ;;  %2924 = vrcp.f32 %v2045_v36  ;;  %v1917_v16 = vpop.xlane.xlu0 %1916  ;;  %v4243_v21 = vsel %vm1846_vm1, %v4230_v7, -inf }
 0x333   : > { %2926 = vpow2.f32 %v1998_v24  ;;  %v2169_v13 = vsub.f32 2.0, %v2137_v2  ;;  %v1962_v38 = vsub.f32 %v4070_v63, %v1917_v16  ;;  %2066 = vadd.xlane.f32.xlu0 %v4235_v18  ;;  %1942 = vmax.xlane.f32.xlu1 %v4243_v21  ;;  %v2004_v22 = vmul.f32 1.442695, %v1958_v12 }
 0x334   : > { %2928 = vpow2.f32 %v2008_v26 }
 0x335   : > { %v2201_v33 = vmul.f32 %v2921_v23, %v2169_v13  ;;  %v2012_v10 = vmul.f32 1.442695, %v1962_v38 }
 0x337   : > { %v2233_v57 = vmul.f32 %v4050_v4, %v2201_v33  ;;  %2930 = vpow2.f32 %v2012_v10  ;;  %v1961_v4 = vsub.f32 %v4057_v39, %v1915_v52 }
 0x338   : > { %v2925_v51 = vpop.eup %2924 }
 0x339   : > { %v4251_v48 = vpop.eup %2926  ;;  %v2265_v63 = vsel %vm1847_vm2, %v3872_v53, %v2233_v57  ;;  %v2138_v24 = vmul.f32 %v2925_v51, %v2045_v36  ;;  %v2047_v40 = vpop.xlane.xlu2 %2046  ;;  %v2010_v16 = vmul.f32 1.442695, %v1961_v4 }
 0x33a   : > { %v4256_v5 = vpop.eup %2928  ;;  %2297 = vst [vmem:[%s4237_s30 + $0x8] sm:$0xff] %v2265_v63  ;;  %2932 = vrcp.f32 %v2047_v40  ;;  %v1919_v17 = vpop.xlane.xlu1 %1918 }
 0x33b   : > { %v2170_v58 = vsub.f32 2.0, %v2138_v24  ;;  %v1963_v23 = vsub.f32 %v4083_v29, %v1919_v17  ;;  %2072 = vadd.xlane.f32.xlu0 %v4256_v5  ;;  %2062 = vadd.xlane.f32.xlu1 %v4251_v48  ;;  %2934 = vpow2.f32 %v2004_v22 }
 0x33d   : > { %v4263_v26 = vpop.eup %2930  ;;  %v2202_v53 = vmul.f32 %v2925_v51, %v2170_v58  ;;  %v2014_v37 = vmul.f32 1.442695, %v1963_v23 }
 0x33e   : > { %2076 = vadd.xlane.f32.xlu2 %v4263_v26 }
 0x33f   : > { %v2234_v2 = vmul.f32 %v4063_v61, %v2202_v53  ;;  %2936 = vpow2.f32 %v2014_v37 }
 0x340   : > { %v2933_v36 = vpop.eup %2932 }
 0x341   : > { %v2266_v29 = vsel %vm1847_vm2, %v3883_v6, %v2234_v2  ;;  %v2139_v13 = vmul.f32 %v2933_v36, %v2047_v40  ;;  %v2049_v38 = vpop.xlane.xlu0 %2048  ;;  %v4270_v12 = vpop.eup %2934 }
 0x342   : > { %2298 = vst [vmem:[%s4237_s30 + $0x10] sm:$0xff] %v2266_v29  ;;  %2938 = vrcp.f32 %v2049_v38  ;;  %v1921_v39 = vpop.xlane.xlu2 %1920 }
 0x343   : > { %v2171_v52 = vsub.f32 2.0, %v2139_v13  ;;  %2068 = vadd.xlane.f32.xlu1 %v4270_v12  ;;  %2940 = vpow2.f32 %v2010_v16  ;;  %v1964_v61 = vsub.f32 %v4096_v20, %v1921_v39 }
 0x345   : > { %v4275_v33 = vpop.eup %2936  ;;  %v2203_v10 = vmul.f32 %v2933_v36, %v2171_v52  ;;  %v2016_v51 = vmul.f32 1.442695, %v1964_v61 }
 0x346   : > { %2078 = vadd.xlane.f32.xlu0 %v4275_v33 }
 0x347   : > { %v2235_v6 = vmul.f32 %v4076_v27, %v2203_v10 }
 0x348   : > { %v2939_v57 = vpop.eup %2938 }
 0x349   : > { %v2267_v22 = vsel %vm1847_vm2, %v3894_v14, %v2235_v6  ;;  %v2140_v63 = vmul.f32 %v2939_v57, %v2049_v38  ;;  %v2051_v24 = vpop.xlane.xlu1 %2050  ;;  %v4282_v40 = vpop.eup %2940 }
 0x34a   : > { %2299 = vst [vmem:[%s4237_s30 + $0x18] sm:$0xff] %v2267_v22  ;;  %2942 = vrcp.f32 %v2051_v24  ;;  %v1923_v20 = vpop.xlane.xlu0 %1922 }
 0x34b   : > { %v2172_v17 = vsub.f32 2.0, %v2140_v63  ;;  %v1965_v58 = vsub.f32 %v4109_v8, %v1923_v20  ;;  %2074 = vadd.xlane.f32.xlu1 %v4282_v40  ;;  %2944 = vpow2.f32 %v2016_v51 }
 0x34d   : > { %v2204_v27 = vmul.f32 %v2939_v57, %v2172_v17  ;;  %v2018_v23 = vmul.f32 1.442695, %v1965_v58 }
 0x34f   : > { %v2236_v4 = vmul.f32 %v4089_v56, %v2204_v27  ;;  %2946 = vpow2.f32 %v2018_v23 }
 0x350   : > { %v2943_v14 = vpop.eup %2942 }
 0x351   : > { %v2268_v53 = vsel %vm1847_vm2, %v3905_v19, %v2236_v4  ;;  %v2141_v37 = vmul.f32 %v2943_v14, %v2051_v24  ;;  %v2053_v2 = vpop.xlane.xlu2 %2052  ;;  %v4291_v36 = vpop.eup %2944 }
 0x352   : > { %2300 = vst [vmem:[%s4237_s30 + $0x20] sm:$0xff] %v2268_v53  ;;  %2948 = vrcp.f32 %v2053_v2  ;;  %v1925_v8 = vpop.xlane.xlu1 %1924 }
 0x353   : > { %v2173_v16 = vsub.f32 2.0, %v2141_v37  ;;  %v1966_v29 = vsub.f32 %v4122_v28, %v1925_v8  ;;  %2080 = vadd.xlane.f32.xlu1 %v4291_v36 }
 0x355   : > { %v4296_v56 = vpop.eup %2946  ;;  %v2205_v13 = vmul.f32 %v2943_v14, %v2173_v16  ;;  %v2020_v38 = vmul.f32 1.442695, %v1966_v29 }
 0x356   : > { %2082 = vadd.xlane.f32.xlu2 %v4296_v56 }
 0x357   : > { %v2237_v19 = vmul.f32 %v4102_v0, %v2205_v13  ;;  %2950 = vpow2.f32 %v2020_v38 }
 0x358   : > { %v2949_v39 = vpop.eup %2948 }
 0x359   : > { %v2269_v52 = vsel %vm1847_vm2, %v3916_v50, %v2237_v19  ;;  %v2142_v61 = vmul.f32 %v2949_v39, %v2053_v2  ;;  %v2055_v10 = vpop.xlane.xlu0 %2054 }
 0x35a   : > { %2301 = vst [vmem:[%s4237_s30 + $0x28] sm:$0xff] %v2269_v52  ;;  %2952 = vrcp.f32 %v2055_v10  ;;  %v1927_v28 = vpop.xlane.xlu2 %1926 }
 0x35b   : > { %v2174_v6 = vsub.f32 2.0, %v2142_v61  ;;  %v1967_v57 = vsub.f32 %v4135_v47, %v1927_v28 }
 0x35d   : > { %v4305_v51 = vpop.eup %2950  ;;  %v2206_v22 = vmul.f32 %v2949_v39, %v2174_v6  ;;  %v2022_v63 = vmul.f32 1.442695, %v1967_v57 }
 0x35e   : > { %2084 = vadd.xlane.f32.xlu0 %v4305_v51 }
 0x35f   : > { %v2238_v0 = vmul.f32 %v4115_v43, %v2206_v22  ;;  %2954 = vpow2.f32 %v2022_v63 }
 0x360   : > { %v2953_v24 = vpop.eup %2952 }
 0x361   : > { %v2270_v50 = vsel %vm1847_vm2, %v3927_v3, %v2238_v0  ;;  %v2143_v20 = vmul.f32 %v2953_v24, %v2055_v10  ;;  %v2057_v17 = vpop.xlane.xlu1 %2056 }
 0x362   : > { %2302 = vst [vmem:[%s4237_s30 + $0x30] sm:$0xff] %v2270_v50  ;;  %2956 = vrcp.f32 %v2057_v17  ;;  %v1929_v47 = vpop.xlane.xlu0 %1928 }
 0x363   : > { %v2175_v58 = vsub.f32 2.0, %v2143_v20  ;;  %v1968_v27 = vsub.f32 %v4148_v46, %v1929_v47 }
 0x365   : > { %v4314_v23 = vpop.eup %2954  ;;  %v2207_v4 = vmul.f32 %v2953_v24, %v2175_v58  ;;  %v2024_v14 = vmul.f32 1.442695, %v1968_v27 }
 0x366   : > { %2086 = vadd.xlane.f32.xlu1 %v4314_v23 }
 0x367   : > { %v2239_v43 = vmul.f32 %v4128_v59, %v2207_v4  ;;  %2958 = vpow2.f32 %v2024_v14 }
 0x368   : > { %v2957_v53 = vpop.eup %2956 }
 0x369   : > { %v2271_v3 = vsel %vm1847_vm2, %v3938_v9, %v2239_v43  ;;  %v2144_v37 = vmul.f32 %v2957_v53, %v2057_v17  ;;  %v2059_v2 = vpop.xlane.xlu2 %2058 }
 0x36a   : > { %2303 = vst [vmem:[%s4237_s30 + $0x38] sm:$0xff] %v2271_v3  ;;  %2960 = vrcp.f32 %v2059_v2  ;;  %v1931_v46 = vpop.xlane.xlu1 %1930 }
 0x36b   : > { %v2176_v8 = vsub.f32 2.0, %v2144_v37  ;;  %v1969_v16 = vsub.f32 %v4161_v30, %v1931_v46 }
 0x36d   : > { %v4323_v29 = vpop.eup %2958  ;;  %v2208_v13 = vmul.f32 %v2957_v53, %v2176_v8  ;;  %v2026_v38 = vmul.f32 1.442695, %v1969_v16 }
 0x36e   : > { %2088 = vadd.xlane.f32.xlu2 %v4323_v29 }
 0x36f   : > { %v2240_v59 = vmul.f32 %v4141_v44, %v2208_v13  ;;  %2962 = vpow2.f32 %v2026_v38 }
 0x370   : > { %v2961_v19 = vpop.eup %2960 }
 0x371   : > { %v2272_v9 = vsel %vm1847_vm2, %v3949_v41, %v2240_v59  ;;  %v2145_v39 = vmul.f32 %v2961_v19, %v2059_v2  ;;  %v2061_v52 = vpop.xlane.xlu0 %2060 }
 0x372   : > { %2304 = vst [vmem:[%s4237_s30 + $0x40] sm:$0xff] %v2272_v9  ;;  %2964 = vrcp.f32 %v2061_v52  ;;  %v1933_v30 = vpop.xlane.xlu2 %1932 }
 0x373   : > { %v2177_v61 = vsub.f32 2.0, %v2145_v39  ;;  %v1970_v10 = vsub.f32 %v4173_v42, %v1933_v30 }
 0x375   : > { %v4332_v28 = vpop.eup %2962  ;;  %v2209_v6 = vmul.f32 %v2961_v19, %v2177_v61  ;;  %v2028_v57 = vmul.f32 1.442695, %v1970_v10 }
 0x376   : > { %2090 = vadd.xlane.f32.xlu0 %v4332_v28 }
 0x377   : > { %v2241_v44 = vmul.f32 %v4154_v34, %v2209_v6  ;;  %2966 = vpow2.f32 %v2028_v57 }
 0x378   : > { %v2965_v41 = vpop.eup %2964 }
 0x379   : > { %v2273_v22 = vsel %vm1847_vm2, %v3960_v11, %v2241_v44  ;;  %v2146_v63 = vmul.f32 %v2965_v41, %v2061_v52 }
 0x37a   : > { %2305 = vst [vmem:[%s4237_s30 + $0x48] sm:$0xff] %v2273_v22  ;;  %v1935_v0 = vpop.xlane.xlu0 %1934 }
 0x37b   : > { %v2178_v24 = vsub.f32 2.0, %v2146_v63  ;;  %v1971_v42 = vsub.f32 %v4182_v31, %v1935_v0 }
 0x37d   : > { %v4341_v50 = vpop.eup %2966  ;;  %v2210_v20 = vmul.f32 %v2965_v41, %v2178_v24  ;;  %v2030_v17 = vmul.f32 1.442695, %v1971_v42  ;;  %v4547_v42 = vld [vmem:[#allocation6_spill] sm:$0xff] }
 0x37e   : > { %2092 = vadd.xlane.f32.xlu1 %v4341_v50 }
 0x37f   : > { %v2242_v34 = vmul.f32 %v4166_v55, %v2210_v20  ;;  %2968 = vpow2.f32 %v2030_v17 }
 0x381   : > { %v2274_v47 = vsel %vm1847_vm2, %v3971_v45, %v2242_v34 }
 0x382   : > { %2306 = vst [vmem:[%s4237_s30 + $0x50] sm:$0xff] %v2274_v47  ;;  %v1937_v11 = vpop.xlane.xlu1 %1936 }
 0x383   : > { %v1972_v58 = vsub.f32 %v4191_v62, %v1937_v11 }
 0x385   : > { %v4350_v27 = vpop.eup %2968  ;;  %v2032_v31 = vmul.f32 1.442695, %v1972_v58 }
 0x386   : > { %2094 = vadd.xlane.f32.xlu2 %v4350_v27 }
 0x387   : > { %2970 = vpow2.f32 %v2032_v31 }
 0x38a   : > { %v1939_v4 = vpop.xlane.xlu2 %1938 }
 0x38b   : > { %v1973_v14 = vsub.f32 %v4200_v60, %v1939_v4 }
 0x38d   : > { %v4354_v43 = vpop.eup %2970  ;;  %v2034_v55 = vmul.f32 1.442695, %v1973_v14 }
 0x38e   : > { %2096 = vadd.xlane.f32.xlu0 %v4354_v43 }
 0x38f   : > { %2972 = vpow2.f32 %v2034_v55 }
 0x392   : > { %v2065_v45 = vpop.xlane.xlu2 %2064 }
 0x393   : > { %2974 = vrcp.f32 %v2065_v45 }
 0x395   : > { %v4357_v53 = vpop.eup %2972 }
 0x396   : > { %2098 = vadd.xlane.f32.xlu1 %v4357_v53 }
 0x399   : > { %v2975_v62 = vpop.eup %2974 }
 0x39a   : > { %v2148_v3 = vmul.f32 %v2975_v62, %v2065_v45  ;;  %v2071_v37 = vpop.xlane.xlu2 %2070 }
 0x39b   : > { %2976 = vrcp.f32 %v2071_v37 }
 0x39c   : > { %v2180_v2 = vsub.f32 2.0, %v2148_v3 }
 0x39e   : > { %v2212_v46 = vmul.f32 %v2975_v62, %v2180_v2  ;;  %v1941_v60 = vpop.xlane.xlu0 %1940 }
 0x39f   : > { %v1974_v8 = vsub.f32 %v4221_v35, %v1941_v60 }
 0x3a0   : > { %v2244_v16 = vmul.f32 %v4206_v49, %v2212_v46  ;;  %v4548_v46 = vld [vmem:[#allocation8_spill] sm:$0xff] }
 0x3a1   : > { %v2977_v13 = vpop.eup %2976  ;;  %v2036_v38 = vmul.f32 1.442695, %v1974_v8 }
 0x3a2   : > { %v2276_v59 = vsel %vm1847_vm2, %v3993_v32, %v2244_v16  ;;  %v2151_v19 = vmul.f32 %v2977_v13, %v2071_v37 }
 0x3a3   : > { %2308 = vst [vmem:[%s4237_s30 + $0x60] sm:$0xff] %v2276_v59  ;;  %2978 = vpow2.f32 %v2036_v38 }
 0x3a4   : > { %v2183_v9 = vsub.f32 2.0, %v2151_v19 }
 0x3a6   : > { %v2215_v39 = vmul.f32 %v2977_v13, %v2183_v9  ;;  %v2067_v52 = vpop.xlane.xlu0 %2066  ;;  %v1943_v30 = vpop.xlane.xlu1 %1942  ;;  %v4549_v13 = vld [vmem:[#allocation5_spill] sm:$0xff] }
 0x3a7   : > { %2980 = vrcp.f32 %v2067_v52  ;;  %v1975_v61 = vsub.f32 %v4243_v21, %v1943_v30 }
 0x3a8   : > { %v2247_v35 = vmul.f32 %v4211_v15, %v2215_v39 }
 0x3a9   : > { %v4368_v49 = vpop.eup %2978  ;;  %v2038_v10 = vmul.f32 1.442695, %v1975_v61 }
 0x3aa   : > { %v2279_v6 = vsel %vm1847_vm2, %v4025_v54, %v2247_v35  ;;  %2100 = vadd.xlane.f32.xlu2 %v4368_v49 }
 0x3ab   : > { %2311 = vst [vmem:[%s4237_s30 + $0x78] sm:$0xff] %v2279_v6  ;;  %2982 = vpow2.f32 %v2038_v10  ;;  %v4551_v6 = vld [vmem:[#allocation7_spill] sm:$0xff] }
 0x3ad   : > { %v2981_v32 = vpop.eup %2980 }
 0x3ae   : > { %v2149_v57 = vmul.f32 %v2981_v32, %v2067_v52  ;;  %v2073_v44 = vpop.xlane.xlu0 %2072  ;;  %v2063_v41 = vpop.xlane.xlu1 %2062 }
 0x3af   : > { %2984 = vrcp.f32 %v2073_v44 }
 0x3b0   : > { %v2181_v21 = vsub.f32 2.0, %v2149_v57  ;;  %2986 = vrcp.f32 %v2063_v41 }
 0x3b1   : > { %v4375_v15 = vpop.eup %2982  ;;  %v2077_v22 = vpop.xlane.xlu2 %2076 }
 0x3b2   : > { %v2213_v63 = vmul.f32 %v2981_v32, %v2181_v21  ;;  %2988 = vrcp.f32 %v2077_v22  ;;  %2102 = vadd.xlane.f32.xlu0 %v4375_v15  ;;  %v4552_v21 = vld [vmem:[#allocation11_spill] sm:$0xff] }
 0x3b4   : > { %v2245_v54 = vmul.f32 %v4235_v18, %v2213_v63 }
 0x3b5   : > { %v2985_v0 = vpop.eup %2984 }
 0x3b6   : > { %v2987_v24 = vpop.eup %2986  ;;  %v2277_v20 = vsel %vm1847_vm2, %v4547_v42, %v2245_v54  ;;  %v2152_v17 = vmul.f32 %v2985_v0, %v2073_v44  ;;  %v2069_v34 = vpop.xlane.xlu1 %2068 }
 0x3b7   : > { %2309 = vst [vmem:[%s4237_s30 + $0x68] sm:$0xff] %v2277_v20  ;;  %v2147_v47 = vmul.f32 %v2987_v24, %v2063_v41  ;;  %2990 = vrcp.f32 %v2069_v34 }
 0x3b8   : > { %v2989_v11 = vpop.eup %2988  ;;  %v2184_v58 = vsub.f32 2.0, %v2152_v17 }
 0x3b9   : > { %v2179_v31 = vsub.f32 2.0, %v2147_v47  ;;  %v2154_v4 = vmul.f32 %v2989_v11, %v2077_v22  ;;  %v2079_v14 = vpop.xlane.xlu0 %2078 }
 0x3ba   : > { %v2216_v55 = vmul.f32 %v2985_v0, %v2184_v58  ;;  %2992 = vrcp.f32 %v2079_v14 }
 0x3bb   : > { %v2211_v18 = vmul.f32 %v2987_v24, %v2179_v31  ;;  %v2186_v45 = vsub.f32 2.0, %v2154_v4  ;;  %v4553_v24 = vld [vmem:[#allocation9_spill] sm:$0xff] }
 0x3bc   : > { %v2248_v62 = vmul.f32 %v4256_v5, %v2216_v55 }
 0x3bd   : > { %v2991_v3 = vpop.eup %2990  ;;  %v2243_v37 = vmul.f32 %v4251_v48, %v2211_v18  ;;  %v2218_v2 = vmul.f32 %v2989_v11, %v2186_v45  ;;  %v4550_v48 = vld [vmem:[#allocation10_spill] sm:$0xff]  ;;  %v4555_v45 = vld [vmem:[#allocation13_spill] sm:$0xff] }
 0x3be   : > { %v2280_v60 = vsel %vm1847_vm2, %v4548_v46, %v2248_v62  ;;  %v2150_v8 = vmul.f32 %v2991_v3, %v2069_v34  ;;  %v2075_v16 = vpop.xlane.xlu1 %2074 }
 0x3bf   : > { %2312 = vst [vmem:[%s4237_s30 + $0x80] sm:$0xff] %v2280_v60  ;;  %v2275_v38 = vsel %vm1847_vm2, %v4549_v13, %v2243_v37  ;;  %v2250_v59 = vmul.f32 %v4263_v26, %v2218_v2  ;;  %2994 = vrcp.f32 %v2075_v16 }
 0x3c0   : > { %v2993_v5 = vpop.eup %2992  ;;  %2307 = vst [vmem:[%s4237_s30 + $0x58] sm:$0xff] %v2275_v38  ;;  %v2182_v19 = vsub.f32 2.0, %v2150_v8  ;;  %v4556_v8 = vld [vmem:[#allocation14_spill] sm:$0xff] }
 0x3c1   : > { %v2282_v9 = vsel %vm1847_vm2, %v4550_v48, %v2250_v59  ;;  %v2155_v39 = vmul.f32 %v2993_v5, %v2079_v14  ;;  %v4554_v14 = vld [vmem:[#allocation12_spill] sm:$0xff]  ;;  %v4557_v48 = vld [vmem:[#allocation15_spill] sm:$0xff] }
 0x3c2   : > { %2314 = vst [vmem:[%s4237_s30 + $0x90] sm:$0xff] %v2282_v9  ;;  %v2214_v52 = vmul.f32 %v2991_v3, %v2182_v19 }
 0x3c3   : > { %v2187_v30 = vsub.f32 2.0, %v2155_v39 }
 0x3c4   : > { %v2246_v61 = vmul.f32 %v4270_v12, %v2214_v52 }
 0x3c5   : > { %v2995_v35 = vpop.eup %2994  ;;  %v2219_v10 = vmul.f32 %v2993_v5, %v2187_v30 }
 0x3c6   : > { %v2278_v26 = vsel %vm1847_vm2, %v4551_v6, %v2246_v61  ;;  %v2153_v32 = vmul.f32 %v2995_v35, %v2075_v16  ;;  %v2081_v57 = vpop.xlane.xlu1 %2080 }
 0x3c7   : > { %2310 = vst [vmem:[%s4237_s30 + $0x70] sm:$0xff] %v2278_v26  ;;  %v2251_v44 = vmul.f32 %v4275_v33, %v2219_v10  ;;  %2996 = vrcp.f32 %v2081_v57  ;;  %v4558_v10 = vld [vmem:[#allocation16_spill] sm:$0xff] }
 0x3c8   : > { %v2185_v41 = vsub.f32 2.0, %v2153_v32 }
 0x3c9   : > { %v2283_v22 = vsel %vm1847_vm2, %v4552_v21, %v2251_v44  ;;  %v2083_v63 = vpop.xlane.xlu2 %2082  ;;  %v4559_v21 = vld [vmem:[#allocation17_spill] sm:$0xff] }
 0x3ca   : > { %2315 = vst [vmem:[%s4237_s30 + $0x98] sm:$0xff] %v2283_v22  ;;  %v2217_v12 = vmul.f32 %v2995_v35, %v2185_v41  ;;  %2998 = vrcp.f32 %v2083_v63 }
 0x3cc   : > { %v2249_v54 = vmul.f32 %v4282_v40, %v2217_v12 }
 0x3cd   : > { %v2997_v0 = vpop.eup %2996 }
 0x3ce   : > { %v2281_v42 = vsel %vm1847_vm2, %v4553_v24, %v2249_v54  ;;  %v2156_v20 = vmul.f32 %v2997_v0, %v2081_v57 }
 0x3cf   : > { %2313 = vst [vmem:[%s4237_s30 + $0x88] sm:$0xff] %v2281_v42  ;;  %v4560_v42 = vld [vmem:[#allocation18_spill] sm:$0xff] }
 0x3d0   : > { %v2999_v33 = vpop.eup %2998  ;;  %v2188_v17 = vsub.f32 2.0, %v2156_v20 }
 0x3d1   : > { %v2157_v34 = vmul.f32 %v2999_v33, %v2083_v63  ;;  %v2085_v47 = vpop.xlane.xlu0 %2084 }
 0x3d2   : > { %v2220_v11 = vmul.f32 %v2997_v0, %v2188_v17  ;;  %3000 = vrcp.f32 %v2085_v47 }
 0x3d3   : > { %v2189_v58 = vsub.f32 2.0, %v2157_v34 }
 0x3d4   : > { %v2252_v31 = vmul.f32 %v4291_v36, %v2220_v11 }
 0x3d5   : > { %v2221_v4 = vmul.f32 %v2999_v33, %v2189_v58  ;;  %v4561_v58 = vld [vmem:[#allocation19_spill] sm:$0xff] }
 0x3d6   : > { %v2284_v40 = vsel %vm1847_vm2, %v4554_v14, %v2252_v31 }
 0x3d7   : > { %2316 = vst [vmem:[%s4237_s30 + $0xa0] sm:$0xff] %v2284_v40  ;;  %v2253_v55 = vmul.f32 %v4296_v56, %v2221_v4 }
 0x3d8   : > { %v3001_v18 = vpop.eup %3000 }
 0x3d9   : > { %v2285_v62 = vsel %vm1847_vm2, %v4555_v45, %v2253_v55  ;;  %v2158_v3 = vmul.f32 %v3001_v18, %v2085_v47  ;;  %v2087_v37 = vpop.xlane.xlu1 %2086  ;;  %v4562_v45 = vld [vmem:[#allocation20_spill] sm:$0xff] }
 0x3da   : > { %2317 = vst [vmem:[%s4237_s30 + $0xa8] sm:$0xff] %v2285_v62  ;;  %3002 = vrcp.f32 %v2087_v37 }
 0x3db   : > { %v2190_v2 = vsub.f32 2.0, %v2158_v3 }
 0x3dd   : > { %v2222_v36 = vmul.f32 %v3001_v18, %v2190_v2 }
 0x3df   : > { %v2254_v46 = vmul.f32 %v4305_v51, %v2222_v36  ;;  %v4563_v36 = vld [vmem:[#allocation21_spill] sm:$0xff] }
 0x3e0   : > { %v3003_v60 = vpop.eup %3002 }
 0x3e1   : > { %v2286_v16 = vsel %vm1847_vm2, %v4556_v8, %v2254_v46  ;;  %v2159_v56 = vmul.f32 %v3003_v60, %v2087_v37  ;;  %v2089_v13 = vpop.xlane.xlu2 %2088 }
 0x3e2   : > { %2318 = vst [vmem:[%s4237_s30 + $0xb0] sm:$0xff] %v2286_v16  ;;  %3004 = vrcp.f32 %v2089_v13 }
 0x3e3   : > { %v2191_v38 = vsub.f32 2.0, %v2159_v56 }
 0x3e5   : > { %v2223_v59 = vmul.f32 %v3003_v60, %v2191_v38 }
 0x3e7   : > { %v2255_v5 = vmul.f32 %v4314_v23, %v2223_v59 }
 0x3e8   : > { %v3005_v19 = vpop.eup %3004 }
 0x3e9   : > { %v2287_v9 = vsel %vm1847_vm2, %v4557_v48, %v2255_v5  ;;  %v2160_v51 = vmul.f32 %v3005_v19, %v2089_v13  ;;  %v2091_v39 = vpop.xlane.xlu0 %2090 }
 0x3ea   : > { %2319 = vst [vmem:[%s4237_s30 + $0xb8] sm:$0xff] %v2287_v9  ;;  %3006 = vrcp.f32 %v2091_v39 }
 0x3eb   : > { %v2192_v52 = vsub.f32 2.0, %v2160_v51 }
 0x3ed   : > { %v2224_v30 = vmul.f32 %v3005_v19, %v2192_v52 }
 0x3ef   : > { %v2256_v61 = vmul.f32 %v4323_v29, %v2224_v30 }
 0x3f0   : > { %v3007_v35 = vpop.eup %3006 }
 0x3f1   : > { %v2288_v6 = vsel %vm1847_vm2, %v4558_v10, %v2256_v61  ;;  %v2161_v23 = vmul.f32 %v3007_v35, %v2091_v39  ;;  %v2093_v26 = vpop.xlane.xlu1 %2092 }
 0x3f2   : > { %2320 = vst [vmem:[%s4237_s30 + $0xc0] sm:$0xff] %v2288_v6  ;;  %3008 = vrcp.f32 %v2093_v26 }
 0x3f3   : > { %v2193_v32 = vsub.f32 2.0, %v2161_v23 }
 0x3f5   : > { %v2225_v57 = vmul.f32 %v3007_v35, %v2193_v32 }
 0x3f7   : > { %v2257_v44 = vmul.f32 %v4332_v28, %v2225_v57 }
 0x3f8   : > { %v3009_v41 = vpop.eup %3008 }
 0x3f9   : > { %v2289_v22 = vsel %vm1847_vm2, %v4559_v21, %v2257_v44  ;;  %v2162_v29 = vmul.f32 %v3009_v41, %v2093_v26  ;;  %v2095_v63 = vpop.xlane.xlu2 %2094 }
 0x3fa   : > { %2321 = vst [vmem:[%s4237_s30 + $0xc8] sm:$0xff] %v2289_v22  ;;  %3010 = vrcp.f32 %v2095_v63 }
 0x3fb   : > { %v2194_v12 = vsub.f32 2.0, %v2162_v29 }
 0x3fd   : > { %v2226_v54 = vmul.f32 %v3009_v41, %v2194_v12 }
 0x3ff   : > { %v2258_v0 = vmul.f32 %v4341_v50, %v2226_v54 }
 0x400   : > { %v3011_v24 = vpop.eup %3010 }
 0x401   : > { %v2290_v20 = vsel %vm1847_vm2, %v4560_v42, %v2258_v0  ;;  %v2163_v28 = vmul.f32 %v3011_v24, %v2095_v63  ;;  %v2097_v33 = vpop.xlane.xlu0 %2096 }
 0x402   : > { %2322 = vst [vmem:[%s4237_s30 + $0xd0] sm:$0xff] %v2290_v20  ;;  %3012 = vrcp.f32 %v2097_v33 }
 0x403   : > { %v2195_v17 = vsub.f32 2.0, %v2163_v28 }
 0x405   : > { %v2227_v34 = vmul.f32 %v3011_v24, %v2195_v17 }
 0x407   : > { %v2259_v47 = vmul.f32 %v4350_v27, %v2227_v34 }
 0x408   : > { %v3013_v11 = vpop.eup %3012 }
 0x409   : > { %v2291_v31 = vsel %vm1847_vm2, %v4561_v58, %v2259_v47  ;;  %v2164_v50 = vmul.f32 %v3013_v11, %v2097_v33  ;;  %v2099_v4 = vpop.xlane.xlu1 %2098 }
 0x40a   : > { %2323 = vst [vmem:[%s4237_s30 + $0xd8] sm:$0xff] %v2291_v31  ;;  %3014 = vrcp.f32 %v2099_v4 }
 0x40b   : > { %v2196_v14 = vsub.f32 2.0, %v2164_v50 }
 0x40d   : > { %v2228_v40 = vmul.f32 %v3013_v11, %v2196_v14 }
 0x40f   : > { %v2260_v55 = vmul.f32 %v4354_v43, %v2228_v40 }
 0x410   : > { %v3015_v18 = vpop.eup %3014 }
 0x411   : > { %v2292_v62 = vsel %vm1847_vm2, %v4562_v45, %v2260_v55  ;;  %v2165_v27 = vmul.f32 %v3015_v18, %v2099_v4 }
 0x412   : > { %2324 = vst [vmem:[%s4237_s30 + $0xe0] sm:$0xff] %v2292_v62 }
 0x413   : > { %v2197_v3 = vsub.f32 2.0, %v2165_v27 }
 0x415   : > { %v2229_v37 = vmul.f32 %v3015_v18, %v2197_v3 }
 0x417   : > { %v2261_v2 = vmul.f32 %v4357_v53, %v2229_v37 }
 0x419   : > { %v2293_v46 = vsel %vm1847_vm2, %v4563_v36, %v2261_v2 }
 0x41a   : > { %2325 = vst [vmem:[%s4237_s30 + $0xe8] sm:$0xff] %v2293_v46 }
 0x41d   : > { %v2101_v60 = vpop.xlane.xlu2 %2100 }
 0x41e   : > { %3016 = vrcp.f32 %v2101_v60 }
 0x424   : > { %v3017_v43 = vpop.eup %3016 }
 0x425   : > { %v2166_v8 = vmul.f32 %v3017_v43, %v2101_v60  ;;  %v2103_v16 = vpop.xlane.xlu0 %2102 }
 0x426   : > { %3018 = vrcp.f32 %v2103_v16 }
 0x427   : > { %v2198_v56 = vsub.f32 2.0, %v2166_v8 }
 0x429   : > { %v2230_v13 = vmul.f32 %v3017_v43, %v2198_v56 }
 0x42b   : > { %v2262_v53 = vmul.f32 %v4368_v49, %v2230_v13 }
 0x42c   : > { %v3019_v38 = vpop.eup %3018 }
 0x42d   : > { %v2294_v59 = vsel %vm1847_vm2, %v4215_v1, %v2262_v53  ;;  %v2167_v5 = vmul.f32 %v3019_v38, %v2103_v16 }
 0x42e   : > { %2326 = vst [vmem:[%s4237_s30 + $0xf0] sm:$0xff] %v2294_v59 }
 0x42f   : > { %v2199_v19 = vsub.f32 2.0, %v2167_v5 }
 0x431   : > { %v2231_v48 = vmul.f32 %v3019_v38, %v2199_v19 }
 0x433   : > { %v2263_v9 = vmul.f32 %v4375_v15, %v2231_v48 }
 0x435   : > { %v2295_v49 = vsel %vm1847_vm2, %v4230_v7, %v2263_v9 }
 0x436   : > { %2327 = vst [vmem:[%s4237_s30 + $0xf8] sm:$0xff] %v2295_v49 }
 0x437   : > { %3047 = shalt.err (!%p3044_p3)
}
 0x438   : > { %s3084_s7 = smov 128   ;;  %s3085_s8 = smov 8  }
 0x439   : > { %2851 = dma.vmem_to_hbm [thread:$0]  (%p3144_p5), %s2342_s24, 4096, %s2344_s25, %s2329_s16, %s3084_s7, %s3084_s7, %s3085_s8  }
 0x43a PF: > { %p2857_p4 = scmp.ge.s32.totalorder %s3082_s15, 2  ;;  %s2358_s9 = sand.u32 1, %s3070_s12  }
 0x43b   : > { %s2359_s10 = scalar_lea.sflag [#allocation3], %s2358_s9 }
 0x43c   : > { %p2854_p7 = pnand %p2857_p4, %p3148_p6 }
 0x43e   : > { %p2855_p8 = pneg %p2854_p7 }
 0x440   : > { %3065 = dma.done.wait (%p2855_p8), %s2359_s10, 4096  }
 0x441   : > { %3067 = vsyncadd (%p2855_p8), %s2359_s10, 4294963200  ;;  %p13_p9 = scmp.ge.s32.totalorder %s3131_s18, 4   ;;  %s4564_s12 = smov %s3074_s13 }
 0x442   : > { %s4565_s13 = smov %s3078_s14  ;;  %s4566_s14 = smov %s3142_s21 }
 0x443   : > { %s4567_s15 = smov %s3131_s18  ;;  %15 = sbr.rel (!%p13_p9) target bundleno = 3 (0x3), region = 67 }
 0x448   :  { %2365 = vsyncpa [#allocation3], 1 }
 0x449   :  { %2367 = vsyncpa [#allocation3 + $0x1], 1 }

</bundles_post_ra>
